<compile_context>
chip_gen: v5e
topology: v5e:2x2
jax: 0.10.0
libtpu: 0.0.40
codegen_flags: <defaults>
</compile_context>

<pallas_src>
import jax
import jax.numpy as jnp
from jax.experimental import pallas as pl
from jax.experimental.pallas import tpu as pltpu


def _make_decoder_kernel(pad_token: int, tile_t: int, num_classes: int):
    def kernel(lp_ref, out_ref, prev_ref):
        t_blk = pl.program_id(1)

        # Reset the cross-tile carry at the start of every batch block's sweep
        # over T.  -1 is a "no previous frame" sentinel (never a valid class),
        # so the first frame is always "new" (unique_consecutive keeps it).
        @pl.when(t_blk == 0)
        def _():
            prev_ref[...] = jnp.full(prev_ref.shape, -1, prev_ref.dtype)

        # Max/compare/select in the input's native dtype (bf16 on v6e/v7x);
        # Mosaic upcasts the cross-lane reduce internally if the HW needs it.
        x = lp_ref[...]                                        # (TB, TT, C)

        # First-index-of-max argmax, decomposed as max + masked-iota + min so
        # it lowers on every Mosaic version.  The iota is (1, 1, C) and is
        # broadcast (replicated sublanes) inside the select instead of being
        # materialised as a separate full block.
        # TODO(synk): fold into a single reduce by packing a monotone-mapped
        # value key with (C-1-class) into one int32 max (halves XLU reduces).
        maxv = jnp.max(x, axis=-1, keepdims=True)              # (TB, TT, 1)
        class_iota = jax.lax.broadcasted_iota(jnp.int32, (1, 1, num_classes), 2)
        idx = jnp.min(
            jnp.where(x == maxv, class_iota, jnp.int32(num_classes)), axis=-1
        ).astype(jnp.int32)                                    # (TB, TT)

        # prev[t] = idx[t-1]; column 0 takes the carry from the previous T
        # tile (or the -1 sentinel on the first tile).  roll = XLU lane rotate.
        shifted = pltpu.roll(idx, shift=1, axis=1)
        t_iota = jax.lax.broadcasted_iota(jnp.int32, idx.shape, 1)
        prev = jnp.where(t_iota == 0, prev_ref[...], shifted)

        # idx == num_classes only when no position matched the max (all-NaN
        # frame); drop such frames so the host never indexes output_labels out
        # of range.  (torch.argmax would pick the NaN slot instead.)
        keep = (
            (idx != prev)
            & (idx != jnp.int32(pad_token))
            & (idx < jnp.int32(num_classes))
        )

        # Single fused output: kept class index, -1 for collapsed/pad frames
        # (halves vector stores + HBM writeback vs. separate idx/mask).
        out_ref[...] = jnp.where(keep, idx, jnp.int32(-1))

        # Carry this tile's last argmax into the next T tile.
        prev_ref[...] = idx[:, tile_t - 1 : tile_t]

    return kernel


def _vmem_budget_bytes() -> int:
    """~75% of physical VMEM, capped at 100 MiB.

    v7x (64 MiB / TC) -> ~48 MiB; v5e / v6e (128 MiB) -> ~96 MiB.
    Falls back to the v7x figure if the hardware query is unavailable.
    """
    cap = 64 * 1024 * 1024
    try:
        info = pltpu.get_tpu_info()
        cap = int(getattr(info, "vmem_capacity_bytes", cap) or cap)
    except Exception:
        pass
    return min((cap * 3) // 4, 100 * 1024 * 1024)


def _pick_tiles(B: int, T: int, C: int, in_itemsize: int, budget: int):
    """Choose (tile_b, tile_t) respecting the (8, 128) layout rules and VMEM."""
    # Output block is (tile_b, tile_t): tile_b must be a multiple of 8 or the
    # whole batch; tile_t a multiple of 128 (unmasked lane-dense stores) or T.
    tile_b = B if B <= 8 else min(32, (B // 8) * 8)

    # Conservative per-frame VMEM bytes: 2x double-buffered input block,
    # ~3 block-sized compare/select/index intermediates, 2x buffered output.
    def per_frame(tb):
        return tb * (2 * C * in_itemsize + 3 * C * 4 + 2 * 4)

    # Shrink the batch tile first if a 128-frame tile would not fit (huge C).
    while tile_b > 8 and budget // per_frame(tile_b) < min(T, 128):
        tile_b -= 8

    if T <= 128:
        return tile_b, T

    max_t = max(1, budget // per_frame(tile_b))
    # Aim for >= ~4 MiB input blocks (amortises the ~0.35 us per-grid-step
    # overhead) without exceeding the VMEM budget.
    target_t = max(1024, (4 * 1024 * 1024) // max(1, tile_b * C * in_itemsize))
    tile_t = min(T, max_t, target_t)
    if tile_t < T:
        tile_t = max(128, (tile_t // 128) * 128)
    return tile_b, tile_t


def greedy_ctc_decode(log_probs: jax.Array, pad_token: int = 0,
                      *, tile_t: int | None = None) -> jax.Array:
    """Returns (B, T) int32: kept argmax class per frame, -1 for collapsed/pad.

    Bandwidth-bound (C values read per one int32 written): feed bf16, and feed
    raw logits where possible -- argmax is invariant under log_softmax, so the
    softmax pass is dead work for greedy decoding.

    TODO(synk): for C < 128 a (B, C, T) producer-side layout (classes on
    sublanes, frames on lanes) avoids 75% lane padding; only worth it if the
    layout comes from upstream (a standalone transpose would double HBM reads).
    """
    B, T, C = log_probs.shape
    budget = _vmem_budget_bytes()
    auto_b, auto_t = _pick_tiles(B, T, C, log_probs.dtype.itemsize, budget)
    tile_b = auto_b
    if tile_t is None:
        tile_t = auto_t
    else:
        tile_t = min(tile_t, T)
        if tile_t < T:
            tile_t = max(128, (tile_t // 128) * 128)

    kernel = _make_decoder_kernel(pad_token, tile_t, C)
    return pl.pallas_call(
        kernel,
        out_shape=jax.ShapeDtypeStruct((B, T), jnp.int32),
        grid_spec=pltpu.PrefetchScalarGridSpec(
            num_scalar_prefetch=0,
            grid=(pl.cdiv(B, tile_b), pl.cdiv(T, tile_t)),
            in_specs=[
                # TODO(synk): try pipeline_mode=pl.Buffered(3) if DMA is still
                # exposed after the tile-size fix (measure first).
                pl.BlockSpec((tile_b, tile_t, C), lambda b, t: (b, t, 0)),
            ],
            out_specs=pl.BlockSpec((tile_b, tile_t), lambda b, t: (b, t)),
            scratch_shapes=[pltpu.VMEM((tile_b, 1), jnp.int32)],
        ),
        compiler_params=pltpu.CompilerParams(
            # B blocks are independent (carry resets at t_blk == 0) ->
            # parallel; T carries dedup state -> arbitrary.
            # TODO(synk): on v7x with a single batch block, split T across the
            # two TensorCores and fix up the one seam frame to use both cores.
            dimension_semantics=("parallel", "arbitrary"),
            vmem_limit_bytes=int(budget),
        ),
    )(log_probs)


class GreedyCTCDecoder:
    """JAX/Pallas port of the PyTorch GreedyCTCDecoder forward pass."""

    def setup(self, output_labels, pad_token: int = 0, tile_t: int | None = None):
        self.output_labels = output_labels
        self.pad_token = pad_token
        self.tile_t = tile_t

    def __call__(self, log_probs: jax.Array):
        fused = greedy_ctc_decode(log_probs, self.pad_token, tile_t=self.tile_t)
        fused = jax.block_until_ready(fused)
        fused_host = jax.device_get(fused)
        # TODO(synk): string assembly has no TPU representation; stays on host.
        return [
            "".join(self.output_labels[int(t)] for t in row if t >= 0)
            for row in fused_host
        ]


if __name__ == "__main__":
    # Small deterministic shapes; T spans 3 tiles at tile_t=128 so the
    # cross-tile duplicate-suppression carry is exercised.
    B, T, C = 2, 384, 32
    key = jax.random.PRNGKey(0)
    # Raw logits in bf16: argmax is invariant under log_softmax, so the
    # softmax pass (a full extra HBM read + write) is skipped entirely.
    logits = jax.random.normal(key, (B, T, C), dtype=jnp.float32).astype(jnp.bfloat16)

    # Deterministic label set: index 0 is the pad/blank token "-".
    labels = ["-"] + [chr(ord("a") + i) for i in range(C - 1)]

    decoder = GreedyCTCDecoder()
    decoder.setup(labels, pad_token=0, tile_t=128)
    preds = decoder(logits)

    # Same decode with auto-sized (large) tiles must agree.
    decoder_auto = GreedyCTCDecoder()
    decoder_auto.setup(labels, pad_token=0)
    preds_auto = decoder_auto(logits)

    # Pure-JAX reference with identical semantics on the same bf16 input.
    ref_idx = jax.device_get(jnp.argmax(logits, axis=-1).astype(jnp.int32))
    ref_preds = []
    for b in range(B):
        out, prev = [], None
        for t in ref_idx[b]:
            t = int(t)
            if t != prev and t != 0:
                out.append(labels[t])
            prev = t
        ref_preds.append("".join(out))

    assert preds == ref_preds, (preds, ref_preds)
    assert preds_auto == ref_preds, (preds_auto, ref_preds)
    print("KERNEL_OK")
</pallas_src>

<mosaic_0001>
module attributes {stable_mosaic.version = 11 : i64} {
  func.func @kernel(%arg0: i32, %arg1: i32, %arg2: memref<2x128x32xbf16, #tpu.memory_space<vmem>>, %arg3: memref<2x128xi32, #tpu.memory_space<vmem>>, %arg4: memref<2x1xi32, #tpu.memory_space<vmem>>) attributes {dimension_semantics = [#tpu.dimension_semantics<parallel>, #tpu.dimension_semantics<arbitrary>], iteration_bounds = array<i64: 1, 3>, scalar_prefetch = 0 : i64, scratch_operands = 1 : i64, tpu.core_type = #tpu.core_type<tc>, window_params = [{transform_indices = @transform_0, window_bounds = array<i64: 2, 128, 32>}, {transform_indices = @transform_1, window_bounds = array<i64: 2, 128>}]} {
    %c0_i32 = arith.constant 0 : i32
    %0 = arith.cmpi eq, %arg1, %c0_i32 : i32
    %1 = arith.extui %0 : i1 to i32
    %c0_i32_0 = arith.constant 0 : i32
    %2 = arith.cmpi ne, %1, %c0_i32_0 : i32
    scf.if %2 {
      %c-1_i32_13 = arith.constant -1 : i32
      %34 = vector.broadcast %c-1_i32_13 : i32 to vector<2x1xi32>
      %c0_14 = arith.constant 0 : index
      %c0_15 = arith.constant 0 : index
      %35 = vector.load %arg4[%c0_14, %c0_15] : memref<2x1xi32, #tpu.memory_space<vmem>>, vector<2x1xi32>
      tpu.vector_store %arg4[%c0_14, %c0_15], %34 {strides = array<i32>} : memref<2x1xi32, #tpu.memory_space<vmem>>, vector<2x1xi32>,
    } else {
    }
    %c0 = arith.constant 0 : index
    %c0_1 = arith.constant 0 : index
    %c0_2 = arith.constant 0 : index
    %3 = vector.load %arg2[%c0, %c0_1, %c0_2] : memref<2x128x32xbf16, #tpu.memory_space<vmem>>, vector<2x128x32xbf16>
    %cst = arith.constant dense<0xFF80> : vector<2x128xbf16>
    %4 = vector.multi_reduction <maximumf>, %3, %cst [2] : vector<2x128x32xbf16> to vector<2x128xbf16>
    %5 = vector.shape_cast %4 : vector<2x128xbf16> to vector<2x128x1xbf16>
    %6 = tpu.iota {dimensions = array<i32: 2>} : vector<1x1x32xi32>
    %7 = vector.broadcast %5 : vector<2x128x1xbf16> to vector<2x128x32xbf16>
    %8 = arith.cmpf oeq, %3, %7 : vector<2x128x32xbf16>
    %c32_i32 = arith.constant 32 : i32
    %9 = vector.shape_cast %6 : vector<1x1x32xi32> to vector<1x1x32xi32>
    %10 = vector.broadcast %9 : vector<1x1x32xi32> to vector<2x128x32xi32>
    %11 = vector.broadcast %c32_i32 : i32 to vector<2x128x32xi32>
    %12 = arith.select %8, %10, %11 : vector<2x128x32xi1>, vector<2x128x32xi32>
    %cst_3 = arith.constant dense<2147483647> : vector<2x128xi32>
    %13 = vector.multi_reduction <minsi>, %12, %cst_3 [2] : vector<2x128x32xi32> to vector<2x128xi32>
    %c1_i32 = arith.constant 1 : i32
    %14 = tpu.dynamic_rotate %13 by %c1_i32 dim 1 : vector<2x128xi32>, i32 -> vector<2x128xi32>
    %15 = tpu.iota {dimensions = array<i32: 1>} : vector<2x128xi32>
    %c0_i32_4 = arith.constant 0 : i32
    %16 = vector.broadcast %c0_i32_4 : i32 to vector<2x128xi32>
    %17 = arith.cmpi eq, %15, %16 : vector<2x128xi32>
    %c0_5 = arith.constant 0 : index
    %c0_6 = arith.constant 0 : index
    %18 = vector.load %arg4[%c0_5, %c0_6] : memref<2x1xi32, #tpu.memory_space<vmem>>, vector<2x1xi32>
    %19 = vector.shape_cast %18 : vector<2x1xi32> to vector<2x1xi32>
    %20 = vector.broadcast %19 : vector<2x1xi32> to vector<2x128xi32>
    %21 = arith.select %17, %20, %14 : vector<2x128xi1>, vector<2x128xi32>
    %22 = arith.cmpi ne, %13, %21 : vector<2x128xi32>
    %c0_i32_7 = arith.constant 0 : i32
    %23 = vector.broadcast %c0_i32_7 : i32 to vector<2x128xi32>
    %24 = arith.cmpi ne, %13, %23 : vector<2x128xi32>
    %25 = arith.andi %22, %24 : vector<2x128xi1>
    %c32_i32_8 = arith.constant 32 : i32
    %26 = vector.broadcast %c32_i32_8 : i32 to vector<2x128xi32>
    %27 = arith.cmpi slt, %13, %26 : vector<2x128xi32>
    %28 = arith.andi %25, %27 : vector<2x128xi1>
    %c-1_i32 = arith.constant -1 : i32
    %29 = vector.broadcast %c-1_i32 : i32 to vector<2x128xi32>
    %30 = arith.select %28, %13, %29 : vector<2x128xi1>, vector<2x128xi32>
    %c0_9 = arith.constant 0 : index
    %c0_10 = arith.constant 0 : index
    %31 = vector.load %arg3[%c0_9, %c0_10] : memref<2x128xi32, #tpu.memory_space<vmem>>, vector<2x128xi32>
    tpu.vector_store %arg3[%c0_9, %c0_10], %30 {strides = array<i32>} : memref<2x128xi32, #tpu.memory_space<vmem>>, vector<2x128xi32>,
    %32 = vector.extract_strided_slice %13 {offsets = [0, 127], sizes = [2, 1], strides = [1, 1]} : vector<2x128xi32> to vector<2x1xi32>
    %c0_11 = arith.constant 0 : index
    %c0_12 = arith.constant 0 : index
    %33 = vector.load %arg4[%c0_11, %c0_12] : memref<2x1xi32, #tpu.memory_space<vmem>>, vector<2x1xi32>
    tpu.vector_store %arg4[%c0_11, %c0_12], %32 {strides = array<i32>} : memref<2x1xi32, #tpu.memory_space<vmem>>, vector<2x1xi32>,
    return
  }
  func.func @transform_0(%arg0: i32, %arg1: i32) -> (i32, i32, i32) {
    %c0_i32 = arith.constant 0 : i32
    %c0_i32_0 = arith.constant 0 : i32
    return %arg0, %arg1, %c0_i32 : i32, i32, i32
  }
  func.func @transform_1(%arg0: i32, %arg1: i32) -> (i32, i32) {
    %c0_i32 = arith.constant 0 : i32
    return %arg0, %arg1 : i32, i32
  }
}

</mosaic_0001>

<bundles_post_ra>
// kernel: tpu_custom_call.1
= control target key start
LH: loop header
LB: loop body
LE: loop exit
PB: predicated region body
PF: predicated region fallthrough
CT: control target
= control target key end

     0   :  { %6 = vsyncpa [#allocation5], 0  ;;  %s3603_s0 = inlined_call_operand.vmem [shape: bf16[2,384,32], index: 0, kind: input, shape index: {}]   ;;  %s3604_s1 = inlined_call_operand.hbm [shape: s32[2,384], index: 1, kind: output, shape index: {}]  }
   0x1   :  { %8 = vsyncpa [#allocation5 + $0x1], 0  ;;  %s2112_s6 = smov 0   ;;  %s2114_s7 = smov 0  }
   0x2   :  { %s2116_s8 = smov 0   ;;  %s2118_s9 = smov 0  }
   0x3   :  { %s2120_s10 = smov 0   ;;  %s2122_s11 = smov 0  }
   0x4 LB: > { %s1830_s12 = sadd.s32 4294967295, %s2097_s11   ;;  %s1831_s13 = sadd.s32 4294967294, %s2097_s11   ;;  %s2097_s11 = sphi %s2122_s11, %s14_s11   ;;  %s2093_s10 = sphi %s2120_s10, %s3770_s10   ;;  %s2089_s9 = sphi %s2118_s9, %s3769_s9   ;;  %s2085_s8 = sphi %s2116_s8, %s3768_s8   ;;  %s2081_s7 = sphi %s2114_s7, %s3767_s7   ;;  %s2077_s6 = sphi %s2112_s6, %s3766_s6  }
   0x5   : > { %s23_s14 = sadd.s32 1, %s2093_s10  ;;  %s35_s15 = sadd.s32 1, %s2085_s8 }
   0x6   : > { %p24_p0 = scmp.ge.s32.totalorder %s23_s14, 3  ;;  %p42_p1 = scmp.ne.s32.totalorder %s2085_s8, %s2081_s7 }
   0x7   : > { %p43_p2 = scmp.eq.s32.totalorder %s2097_s11, 0  ;;  %p74_p3 = scmp.eq.s32.totalorder %s1830_s12, 2 }
   0x8   : > { %s3772_s14 = smov (%p24_p0, %s23_s14), 0  ;;  %p79_p6 = scmp.ne.s32.totalorder %s2081_s7, %s2077_s6 }
   0x9   : > { %p44_p4 = por %p43_p2, %p42_p1  ;;  %p2151_p5 = por %p74_p3, %p42_p1 }
   0xa   : > { %s31_s17 = ssub.s32 %s2093_s10, %s3772_s14  ;;  %p80_p8 = scmp.eq.s32.totalorder %s1831_s13, 2 }
   0xb   : > { %p33_p7 = scmp.eq.s32.totalorder %s31_s17, 0  ;;  %p1833_p10 = scmp.ge.s32.totalorder %s2097_s11, 3 }
   0xc   : > { %p2162_p9 = por %p80_p8, %p79_p6 }
   0xd   : > { %s2160_s18 = scalar_select %p33_p7, %s2085_s8, %s35_s15  }
   0xe   : > { %96 = sbr.rel (%p1833_p10) target bundleno = 39 (0x27), region = 16 }
  0x13   : > { %99 = sbr.rel (!%p44_p4) target bundleno = 39 (0x27), region = 20  ;;  %s101_s20 = sand.u32 (%p44_p4), 1, %s2085_s8  }
  0x14   : > { %s1845_s21 = sshll.u32 (%p44_p4), %s2093_s10, 6  ;;  %s1834_s22 = sshll.u32 (%p44_p4), %s101_s20, 7 }
  0x15   : > { %s2172_s25 = scalar_lea.vmem (%p44_p4), %s3603_s0, %s1845_s21  ;;  %s103_s26 = scalar_lea.vmem (%p44_p4), [#allocation3], %s1834_s22 }
  0x16   : > { %v126_v0 = vld [vmem:[%s2172_s25] sm:$0xff] (%p44_p4)   ;;  %v130_v1 = vld [vmem:[%s2172_s25 + $0x8] sm:$0xff] (%p44_p4)   ;;  %v134_v2 = vld [vmem:[%s2172_s25 + $0x10] sm:$0xff] (%p44_p4)  }
  0x17   : > { %127 = vst [vmem:[%s103_s26] sm:$0xff] (%p44_p4), %v126_v0   ;;  %v138_v3 = vld [vmem:[%s2172_s25 + $0x18] sm:$0xff] (%p44_p4)   ;;  %v142_v4 = vld [vmem:[%s2172_s25 + $0x20] sm:$0xff] (%p44_p4)   ;;  %v146_v5 = vld [vmem:[%s2172_s25 + $0x28] sm:$0xff] (%p44_p4)  }
  0x18   : > { %131 = vst [vmem:[%s103_s26 + $0x8] sm:$0xff] %v130_v1   ;;  %v150_v6 = vld [vmem:[%s2172_s25 + $0x30] sm:$0xff]   ;;  %v154_v7 = vld [vmem:[%s2172_s25 + $0x38] sm:$0xff]   ;;  %v158_v8 = vld [vmem:[%s2172_s25 + $0xc0] sm:$0xff]  }
  0x19   : > { %135 = vst [vmem:[%s103_s26 + $0x10] sm:$0xff] %v134_v2   ;;  %v162_v9 = vld [vmem:[%s2172_s25 + $0xc8] sm:$0xff]   ;;  %v166_v10 = vld [vmem:[%s2172_s25 + $0xd0] sm:$0xff]   ;;  %v170_v11 = vld [vmem:[%s2172_s25 + $0xd8] sm:$0xff]  }
  0x1a   : > { %139 = vst [vmem:[%s103_s26 + $0x18] sm:$0xff] %v138_v3   ;;  %v174_v12 = vld [vmem:[%s2172_s25 + $0xe0] sm:$0xff]   ;;  %v178_v13 = vld [vmem:[%s2172_s25 + $0xe8] sm:$0xff]   ;;  %v182_v14 = vld [vmem:[%s2172_s25 + $0xf0] sm:$0xff]  }
  0x1b   : > { %143 = vst [vmem:[%s103_s26 + $0x20] sm:$0xff] %v142_v4   ;;  %v186_v15 = vld [vmem:[%s2172_s25 + $0xf8] sm:$0xff]  }
  0x1c   : > { %147 = vst [vmem:[%s103_s26 + $0x28] sm:$0xff] %v146_v5  }
  0x1d   : > { %151 = vst [vmem:[%s103_s26 + $0x30] sm:$0xff] %v150_v6  }
  0x1e   : > { %155 = vst [vmem:[%s103_s26 + $0x38] sm:$0xff] %v154_v7  }
  0x1f   : > { %159 = vst [vmem:[%s103_s26 + $0x40] sm:$0xff] %v158_v8  }
  0x20   : > { %163 = vst [vmem:[%s103_s26 + $0x48] sm:$0xff] %v162_v9  }
  0x21   : > { %167 = vst [vmem:[%s103_s26 + $0x50] sm:$0xff] %v166_v10  }
  0x22   : > { %171 = vst [vmem:[%s103_s26 + $0x58] sm:$0xff] %v170_v11  }
  0x23   : > { %175 = vst [vmem:[%s103_s26 + $0x60] sm:$0xff] %v174_v12  }
  0x24   : > { %179 = vst [vmem:[%s103_s26 + $0x68] sm:$0xff] %v178_v13  }
  0x25   : > { %183 = vst [vmem:[%s103_s26 + $0x70] sm:$0xff] %v182_v14  }
  0x26   : > { %187 = vst [vmem:[%s103_s26 + $0x78] sm:$0xff] %v186_v15  }
  0x27 PF: > { %p1837_p11 = scmp.ge.s32.totalorder %s2097_s11, 1  ;;  %p276_p12 = scmp.lt.s32.totalorder %s2097_s11, 4 }
  0x29   : > { %p277_p13 = pnand %p1837_p11, %p276_p12 }
  0x2b   : > { %280 = sbr.rel (%p277_p13) target bundleno = 1056 (0x420), region = 61 }
  0x30   : > { %s2193_s27 = sand.u32 1, %s2081_s7   ;;  %p1840_p0 = scmp.ne.s32.totalorder %s2089_s9, 0 }
  0x31   : > { %s1838_s28 = sshll.u32 %s2193_s27, 7  ;;  %s1839_s29 = sshll.u32 %s2193_s27, 1 }
  0x32   : > { %s2197_s30 = scalar_lea.vmem [#allocation3], %s1838_s28  ;;  %s2199_s2 = scalar_lea.vmem [#allocation4], %s1839_s29 }
  0x33   : > { %307 = sbr.rel (%p1840_p0) target bundleno = 58 (0x3a), region = 69 }
  0x38   : > { %vm308_vm0 = vcmask 1024   ;;  %v2099_v16 = vmov 4294967295  }
  0x39   : > { %309 = vst.msk [vmem:[#allocation2] sm:$0x3] %vm308_vm0, %v2099_v16 }
  0x3a PF: > { %v2203_v17 = vld [vmem:[%s2197_s30 + $0x10] sm:$0xff]   ;;  %vm374_vm1 = vcmask 261120   ;;  %v2206_v18 = vld [vmem:[%s2197_s30 + $0x8] sm:$0xff]   ;;  %v2209_v19 = vld [vmem:[%s2197_s30] sm:$0xff]   ;;  %s2101_s3 = smov 1   ;;  %s1842_s4 = sshll.u32 %s2089_s9, 1 }
  0x3b   : > { %v1856_v20 = vunpack.c.l.bf16 %v2203_v17  ;;  %v1852_v21 = vunpack.c.l.bf16 %v2206_v18  ;;  %v1848_v22 = vunpack.c.l.bf16 %v2209_v19  ;;  %v1857_v26 = vunpack.c.h.bf16 %v2203_v17  ;;  %v2236_v32 = vld [vmem:[%s2197_s30 + $0x20] sm:$0xff]   ;;  %v2239_v33 = vld [vmem:[%s2197_s30 + $0x18] sm:$0xff]   ;;  %v2254_v40 = vld [vmem:[%s2197_s30 + $0x28] sm:$0xff]   ;;  %s1747_s13 = scalar_lea.hbm %s3604_s1, %s1842_s4  ;;  %s1749_s9 = sshll.u32 %s2199_s2, 4  ;;  %s1750_s9 = int_to_ptr.vmem [resolvable:$true] %s1749_s9 }
  0x3c   : > { %v1853_v27 = vunpack.c.h.bf16 %v2206_v18  ;;  %v1849_v28 = vunpack.c.h.bf16 %v2209_v19  ;;  %v1864_v34 = vunpack.c.l.bf16 %v2236_v32  ;;  %v1861_v35 = vunpack.c.h.bf16 %v2239_v33  ;;  %v2269_v47 = vld [vmem:[%s2197_s30 + $0x38] sm:$0xff]   ;;  %v2272_v48 = vld [vmem:[%s2197_s30 + $0x30] sm:$0xff]   ;;  %v2287_v55 = vld [vmem:[%s2197_s30 + $0x40] sm:$0xff]   ;;  %s1751_s15 = sshll.u32 %s1747_s13, 4  ;;  %s1735_s17 = scalar_lea.sflag [#allocation5], %s2193_s27  ;;  %s1752_s15 = int_to_ptr.hbm [resolvable:$true] %s1751_s15 }
  0x3d   : > { %v387_v23 = vsel %vm374_vm1, %v1856_v20, -inf  ;;  %v381_v24 = vsel %vm374_vm1, %v1852_v21, -inf  ;;  %v375_v25 = vsel %vm374_vm1, %v1848_v22, -inf  ;;  %v390_v29 = vsel %vm374_vm1, %v1857_v26, -inf  ;;  %v2302_v62 = vld [vmem:[%s2197_s30 + $0x50] sm:$0xff]   ;;  %v2305_v63 = vld [vmem:[%s2197_s30 + $0x48] sm:$0xff]  }
  0x3e   : > { %388 = vmax.xlane.f32.xlu2 %v387_v23  ;;  %382 = vmax.xlane.f32.xlu1 %v381_v24  ;;  %v384_v30 = vsel %vm374_vm1, %v1853_v27, -inf  ;;  %v378_v31 = vsel %vm374_vm1, %v1849_v28, -inf  ;;  %v1860_v36 = vunpack.c.l.bf16 %v2239_v33  ;;  %v399_v37 = vsel %vm374_vm1, %v1864_v34, -inf  ;;  %v2320_v6 = vld [vmem:[%s2197_s30 + $0x58] sm:$0xff]   ;;  %v2335_v13 = vld [vmem:[%s2197_s30 + $0x68] sm:$0xff]   ;;  %v2338_v14 = vld [vmem:[%s2197_s30 + $0x60] sm:$0xff]  }
  0x3f   : > { %376 = vmax.xlane.f32.xlu0 %v375_v25  ;;  %v396_v38 = vsel %vm374_vm1, %v1861_v35, -inf  ;;  %v1869_v41 = vunpack.c.h.bf16 %v2254_v40  ;;  %v1868_v42 = vunpack.c.l.bf16 %v2254_v40  ;;  %v1865_v43 = vunpack.c.h.bf16 %v2236_v32  ;;  %s2033_s20 = sshra.s32 %s1752_s15, 4  ;;  %s2039_s24 = scalar_lea.hbm %s3604_s1, 6  ;;  %s2034_s20 = int_to_ptr.hbm [resolvable:$true] %s2033_s20 }
  0x40   : > { %v393_v39 = vsel %vm374_vm1, %v1860_v36, -inf  ;;  %v1876_v49 = vunpack.c.l.bf16 %v2269_v47  ;;  %v1873_v50 = vunpack.c.h.bf16 %v2272_v48  ;;  %v1872_v51 = vunpack.c.l.bf16 %v2272_v48  ;;  %s2035_s21 = scalar_lea.hbm %s2034_s20, 2  ;;  %p2040_p4 = scmp.lt.s32.totalorder %s2034_s20, %s3604_s1 }
  0x41   : > { %v408_v44 = vsel %vm374_vm1, %v1869_v41, -inf  ;;  %v405_v45 = vsel %vm374_vm1, %v1868_v42, -inf  ;;  %v402_v46 = vsel %vm374_vm1, %v1865_v43, -inf  ;;  %v1881_v56 = vunpack.c.h.bf16 %v2287_v55  ;;  %p2036_p1 = scmp.ne.s32.totalorder %s2034_s20, %s2035_s21  ;;  %p2041_p6 = scmp.lt.s32.totalorder %s2039_s24, %s2035_s21 }
  0x42   : > { %v417_v52 = vsel %vm374_vm1, %v1876_v49, -inf  ;;  %v414_v53 = vsel %vm374_vm1, %v1873_v50, -inf  ;;  %v411_v54 = vsel %vm374_vm1, %v1872_v51, -inf  ;;  %v1880_v57 = vunpack.c.l.bf16 %v2287_v55 }
  0x43   : > { %v1877_v58 = vunpack.c.h.bf16 %v2269_v47  ;;  %v426_v59 = vsel %vm374_vm1, %v1881_v56, -inf  ;;  %v1888_v0 = vunpack.c.l.bf16 %v2302_v62  ;;  %v1885_v1 = vunpack.c.h.bf16 %v2305_v63  ;;  %p2037_p2 = pnand %p2036_p1, %p2151_p5  ;;  %p2042_p7 = por %p2041_p6, %p2040_p4 }
  0x44   : > { %v423_v60 = vsel %vm374_vm1, %v1880_v57, -inf  ;;  %v1884_v2 = vunpack.c.l.bf16 %v2305_v63  ;;  %v1893_v7 = vunpack.c.h.bf16 %v2320_v6  ;;  %v1892_v8 = vunpack.c.l.bf16 %v2320_v6 }
  0x45   : > { %v420_v61 = vsel %vm374_vm1, %v1877_v58, -inf  ;;  %v435_v3 = vsel %vm374_vm1, %v1888_v0, -inf  ;;  %v432_v4 = vsel %vm374_vm1, %v1885_v1, -inf  ;;  %v1889_v9 = vunpack.c.h.bf16 %v2302_v62  ;;  %p2038_p3 = pneg %p2037_p2 }
  0x46   : > { %391 = vmax.xlane.f32.xlu2 %v390_v29  ;;  %385 = vmax.xlane.f32.xlu1 %v384_v30  ;;  %v429_v5 = vsel %vm374_vm1, %v1884_v2, -inf  ;;  %v444_v10 = vsel %vm374_vm1, %v1893_v7, -inf  ;;  %v441_v11 = vsel %vm374_vm1, %v1892_v8, -inf  ;;  %v3613_v15 = vunpack.c.l.bf16 %v2335_v13  ;;  %v2353_v30 = vld [vmem:[%s2197_s30 + $0x70] sm:$0xff]  }
  0x47   : > { %379 = vmax.xlane.f32.xlu0 %v378_v31  ;;  %v438_v12 = vsel %vm374_vm1, %v1889_v9, -inf  ;;  %v3612_v16 = vunpack.c.h.bf16 %v2338_v14  ;;  %v3611_v23 = vunpack.c.l.bf16 %v2338_v14  ;;  %v3610_v31 = vunpack.c.h.bf16 %v2353_v30  ;;  %p2043_p8 = pnand %p2042_p7, %p2038_p3 }
  0x48   : > { %v453_v24 = vsel %vm374_vm1, %v3613_v15, -inf }
  0x49   : > { %v450_v25 = vsel %vm374_vm1, %v3612_v16, -inf  ;;  %v447_v29 = vsel %vm374_vm1, %v3611_v23, -inf }
  0x4e   : > { %400 = vmax.xlane.f32.xlu2 %v399_v37  ;;  %397 = vmax.xlane.f32.xlu1 %v396_v38  ;;  %v3609_v37 = vunpack.c.l.bf16 %v2353_v30  ;;  %v3608_v38 = vunpack.c.h.bf16 %v2335_v13 }
  0x4f   : > { %394 = vmax.xlane.f32.xlu0 %v393_v39  ;;  %v462_v39 = vsel %vm374_vm1, %v3610_v31, -inf }
  0x56   : > { %409 = vmax.xlane.f32.xlu2 %v408_v44  ;;  %406 = vmax.xlane.f32.xlu1 %v405_v45  ;;  %v459_v44 = vsel %vm374_vm1, %v3609_v37, -inf  ;;  %v456_v45 = vsel %vm374_vm1, %v3608_v38, -inf }
  0x57   : > { %403 = vmax.xlane.f32.xlu0 %v402_v46  ;;  %v2368_v46 = vld [vmem:[%s2197_s30 + $0x78] sm:$0xff]  }
  0x5e   : > { %418 = vmax.xlane.f32.xlu2 %v417_v52  ;;  %415 = vmax.xlane.f32.xlu1 %v414_v53  ;;  %v3607_v52 = vunpack.c.h.bf16 %v2368_v46  ;;  %v3606_v53 = vunpack.c.l.bf16 %v2368_v46 }
  0x5f   : > { %412 = vmax.xlane.f32.xlu0 %v411_v54 }
  0x60   : > { %v468_v54 = vsel %vm374_vm1, %v3607_v52, -inf }
  0x66   : > { %427 = vmax.xlane.f32.xlu2 %v426_v59  ;;  %424 = vmax.xlane.f32.xlu1 %v423_v60  ;;  %v465_v59 = vsel %vm374_vm1, %v3606_v53, -inf  ;;  %v3605_v60 = vlaneseq }
  0x67   : > { %421 = vmax.xlane.f32.xlu0 %v420_v61 }
  0x6e   : > { %436 = vmax.xlane.f32.xlu2 %v435_v3  ;;  %433 = vmax.xlane.f32.xlu1 %v432_v4 }
  0x6f   : > { %430 = vmax.xlane.f32.xlu0 %v429_v5 }
  0x76   : > { %445 = vmax.xlane.f32.xlu2 %v444_v10  ;;  %442 = vmax.xlane.f32.xlu1 %v441_v11  ;;  %v2379_v11 = vand.u32 127, %v3605_v60 }
  0x77   : > { %439 = vmax.xlane.f32.xlu0 %v438_v12 }
  0x78   : > { %3662 = vst [vmem:[#allocation7_spill] sm:$0xff] %v2379_v11 }
  0x7e   : > { %454 = vmax.xlane.f32.xlu2 %v453_v24  ;;  %451 = vmax.xlane.f32.xlu1 %v450_v25 }
  0x7f   : > { %448 = vmax.xlane.f32.xlu0 %v447_v29 }
  0x86   : > { %463 = vmax.xlane.f32.xlu2 %v462_v39  ;;  %460 = vmax.xlane.f32.xlu1 %v459_v44 }
  0x87   : > { %457 = vmax.xlane.f32.xlu0 %v456_v45 }
  0x8e   : > { %469 = vmax.xlane.f32.xlu1 %v468_v54 }
  0x8f   : > { %466 = vmax.xlane.f32.xlu0 %v465_v59 }
  0xb1   : > { %v389_v61 = vpop.xlane.xlu2 %388  ;;  %v383_v3 = vpop.xlane.xlu1 %382 }
  0xb2   : > { %v473_v4 = vpack.c.bf16 %v383_v3, %v383_v3  ;;  %v377_v5 = vpop.xlane.xlu0 %376  ;;  %v475_v25 = vpack.c.bf16 %v389_v61, %v389_v61 }
  0xb3   : > { %v471_v10 = vpack.c.bf16 %v377_v5, %v377_v5 }
  0xb4   : > { %v507_v12 = vunpack.c.l.bf16 %v473_v4 }
  0xb5   : > { %v505_v24 = vunpack.c.l.bf16 %v471_v10 }
  0xb6   : > { %vm539_vm2 = vcmp.eq.f32.partialorder %v1852_v21, %v507_v12 }
  0xb7   : > { %vm537_vm3 = vcmp.eq.f32.partialorder %v1848_v22, %v505_v24  ;;  %v571_v29 = vsel %vm539_vm2, %v2379_v11, 32  ;;  %v509_v22 = vunpack.c.l.bf16 %v475_v25 }
  0xb8   : > { %v2387_v39 = vsel %vm374_vm1, %v571_v29, 2147483647  ;;  %v569_v44 = vsel %vm537_vm3, %v2379_v11, 32 }
  0xb9   : > { %v392_v45 = vpop.xlane.xlu2 %391  ;;  %v386_v54 = vpop.xlane.xlu1 %385  ;;  %v633_v59 = vshra.s32 %v2387_v39, 16  ;;  %v2392_v3 = vsel %vm374_vm1, %v569_v44, 2147483647  ;;  %vm2407_vm6 = vcmp.eq.f32.partialorder %v1856_v20, %v509_v22 }
  0xba   : > { %v476_v4 = vpack.c.bf16 %v392_v45, %v392_v45  ;;  %v474_v21 = vpack.c.bf16 %v386_v54, %v386_v54  ;;  %v380_v61 = vpop.xlane.xlu0 %379  ;;  %v603_v5 = vshra.s32 %v2392_v3, 16 }
  0xbb   : > { %v472_v10 = vpack.c.bf16 %v380_v61, %v380_v61  ;;  %v2395_v12 = vcvt.s32.f32 %v633_v59  ;;  %v573_v61 = vsel %vm2407_vm6, %v2379_v11, 32 }
  0xbc   : > { %v510_v24 = vunpack.c.l.bf16 %v476_v4  ;;  %v508_v29 = vunpack.c.l.bf16 %v474_v21  ;;  %v2397_v60 = vcvt.s32.f32 %v603_v5 }
  0xbd   : > { %v506_v53 = vunpack.c.l.bf16 %v472_v10  ;;  %636 = vmin.xlane.f32.xlu0 %v2395_v12 }
  0xbe   : > { %vm542_vm4 = vcmp.eq.f32.partialorder %v1857_v26, %v510_v24  ;;  %vm540_vm5 = vcmp.eq.f32.partialorder %v1853_v27, %v508_v29  ;;  %606 = vmin.xlane.f32.xlu2 %v2397_v60 }
  0xbf   : > { %vm538_vm7 = vcmp.eq.f32.partialorder %v1849_v28, %v506_v53  ;;  %v574_v44 = vsel %vm542_vm4, %v2379_v11, 32  ;;  %v572_v45 = vsel %vm540_vm5, %v2379_v11, 32 }
  0xc0   : > { %v2416_v26 = vsel %vm374_vm1, %v574_v44, 2147483647  ;;  %v2419_v18 = vsel %vm374_vm1, %v572_v45, 2147483647  ;;  %v570_v27 = vsel %vm538_vm7, %v2379_v11, 32 }
  0xc1   : > { %v401_v17 = vpop.xlane.xlu2 %400  ;;  %v678_v20 = vshra.s32 %v2416_v26, 16  ;;  %v648_v54 = vshra.s32 %v2419_v18, 16  ;;  %v2425_v19 = vsel %vm374_vm1, %v570_v27, 2147483647  ;;  %v398_v28 = vpop.xlane.xlu1 %397  ;;  %v2439_v27 = vsel %vm374_vm1, %v573_v61, 2147483647 }
  0xc2   : > { %v479_v53 = vpack.c.bf16 %v401_v17, %v401_v17  ;;  %v395_v59 = vpop.xlane.xlu0 %394  ;;  %v618_v4 = vshra.s32 %v2425_v19, 16  ;;  %v478_v21 = vpack.c.bf16 %v398_v28, %v398_v28 }
  0xc3   : > { %v477_v5 = vpack.c.bf16 %v395_v59, %v395_v59  ;;  %v2431_v22 = vcvt.s32.f32 %v678_v20  ;;  %v2433_v10 = vcvt.s32.f32 %v648_v54 }
  0xc4   : > { %v513_v24 = vunpack.c.l.bf16 %v479_v53  ;;  %v2435_v29 = vcvt.s32.f32 %v618_v4  ;;  %v512_v44 = vunpack.c.l.bf16 %v478_v21 }
  0xc5   : > { %v511_v45 = vunpack.c.l.bf16 %v477_v5  ;;  %681 = vmin.xlane.f32.xlu0 %v2431_v22 }
  0xc6   : > { %vm545_vm8 = vcmp.eq.f32.partialorder %v1864_v34, %v513_v24  ;;  %651 = vmin.xlane.f32.xlu2 %v2433_v10  ;;  %621 = vmin.xlane.f32.xlu1 %v2435_v29  ;;  %vm2447_vm9 = vcmp.eq.f32.partialorder %v1861_v35, %v512_v44  ;;  %v663_v34 = vshra.s32 %v2439_v27, 16 }
  0xc7   : > { %vm543_vm10 = vcmp.eq.f32.partialorder %v1860_v36, %v511_v45  ;;  %v577_v17 = vsel %vm545_vm8, %v2379_v11, 32  ;;  %v576_v28 = vsel %vm2447_vm9, %v2379_v11, 32 }
  0xc8   : > { %v2455_v20 = vsel %vm374_vm1, %v577_v17, 2147483647  ;;  %v575_v54 = vsel %vm543_vm10, %v2379_v11, 32  ;;  %v2470_v44 = vsel %vm374_vm1, %v576_v28, 2147483647  ;;  %v2472_v25 = vcvt.s32.f32 %v663_v34 }
  0xc9   : > { %v410_v35 = vpop.xlane.xlu2 %409  ;;  %v723_v53 = vshra.s32 %v2455_v20, 16  ;;  %v2464_v59 = vsel %vm374_vm1, %v575_v54, 2147483647  ;;  %v407_v33 = vpop.xlane.xlu1 %406  ;;  %v708_v34 = vshra.s32 %v2470_v44, 16 }
  0xca   : > { %v482_v36 = vpack.c.bf16 %v410_v35, %v410_v35  ;;  %v404_v4 = vpop.xlane.xlu0 %403  ;;  %v693_v21 = vshra.s32 %v2464_v59, 16  ;;  %v481_v61 = vpack.c.bf16 %v407_v33, %v407_v33 }
  0xcb   : > { %v480_v5 = vpack.c.bf16 %v404_v4, %v404_v4  ;;  %v2467_v24 = vcvt.s32.f32 %v723_v53  ;;  %v2502_v4 = vcvt.s32.f32 %v708_v34 }
  0xcc   : > { %v516_v45 = vunpack.c.l.bf16 %v482_v36  ;;  %v2474_v17 = vcvt.s32.f32 %v693_v21  ;;  %v515_v52 = vunpack.c.l.bf16 %v481_v61 }
  0xcd   : > { %v514_v54 = vunpack.c.l.bf16 %v480_v5  ;;  %726 = vmin.xlane.f32.xlu0 %v2467_v24 }
  0xce   : > { %vm548_vm11 = vcmp.eq.f32.partialorder %v1869_v41, %v516_v45  ;;  %666 = vmin.xlane.f32.xlu1 %v2472_v25  ;;  %696 = vmin.xlane.f32.xlu2 %v2474_v17  ;;  %vm2483_vm12 = vcmp.eq.f32.partialorder %v1868_v42, %v515_v52 }
  0xcf   : > { %vm546_vm13 = vcmp.eq.f32.partialorder %v1865_v43, %v514_v54  ;;  %v580_v35 = vsel %vm548_vm11, %v2379_v11, 32  ;;  %v579_v40 = vsel %vm2483_vm12, %v2379_v11, 32 }
  0xd0   : > { %v2492_v53 = vsel %vm374_vm1, %v580_v35, 2147483647  ;;  %v578_v41 = vsel %vm546_vm13, %v2379_v11, 32  ;;  %v2508_v54 = vsel %vm374_vm1, %v579_v40, 2147483647 }
  0xd1   : > { %v419_v42 = vpop.xlane.xlu2 %418  ;;  %v768_v52 = vshra.s32 %v2492_v53, 16  ;;  %v2500_v33 = vsel %vm374_vm1, %v578_v41, 2147483647  ;;  %v416_v36 = vpop.xlane.xlu1 %415  ;;  %v753_v40 = vshra.s32 %v2508_v54, 16 }
  0xd2   : > { %v485_v32 = vpack.c.bf16 %v419_v42, %v419_v42  ;;  %v413_v43 = vpop.xlane.xlu0 %412  ;;  %v738_v21 = vshra.s32 %v2500_v33, 16  ;;  %v484_v61 = vpack.c.bf16 %v416_v36, %v416_v36 }
  0xd3   : > { %v483_v5 = vpack.c.bf16 %v413_v43, %v413_v43  ;;  %v2505_v45 = vcvt.s32.f32 %v768_v52 }
  0xd4   : > { %v519_v28 = vunpack.c.l.bf16 %v485_v32  ;;  %v2510_v35 = vcvt.s32.f32 %v738_v21  ;;  %v518_v38 = vunpack.c.l.bf16 %v484_v61  ;;  %v2538_v21 = vcvt.s32.f32 %v753_v40 }
  0xd5   : > { %v517_v41 = vunpack.c.l.bf16 %v483_v5  ;;  %771 = vmin.xlane.f32.xlu0 %v2505_v45 }
  0xd6   : > { %vm551_vm14 = vcmp.eq.f32.partialorder %v1876_v49, %v519_v28  ;;  %711 = vmin.xlane.f32.xlu1 %v2502_v4  ;;  %741 = vmin.xlane.f32.xlu2 %v2510_v35  ;;  %vm2519_vm15 = vcmp.eq.f32.partialorder %v1873_v50, %v518_v38 }
  0xd7   : > { %vm549_vm0 = vcmp.eq.f32.partialorder %v1872_v51, %v517_v41  ;;  %v583_v42 = vsel %vm551_vm14, %v2379_v11, 32  ;;  %v582_v36 = vsel %vm2519_vm15, %v2379_v11, 32 }
  0xd8   : > { %v2528_v52 = vsel %vm374_vm1, %v583_v42, 2147483647  ;;  %v581_v49 = vsel %vm549_vm0, %v2379_v11, 32  ;;  %v2544_v34 = vsel %vm374_vm1, %v582_v36, 2147483647 }
  0xd9   : > { %v428_v50 = vpop.xlane.xlu2 %427  ;;  %v813_v38 = vshra.s32 %v2528_v52, 16  ;;  %v2536_v32 = vsel %vm374_vm1, %v581_v49, 2147483647  ;;  %v425_v43 = vpop.xlane.xlu1 %424  ;;  %v798_v36 = vshra.s32 %v2544_v34, 16 }
  0xda   : > { %v488_v48 = vpack.c.bf16 %v428_v50, %v428_v50  ;;  %v422_v51 = vpop.xlane.xlu0 %421  ;;  %v783_v61 = vshra.s32 %v2536_v32, 16  ;;  %v487_v5 = vpack.c.bf16 %v425_v43, %v425_v43 }
  0xdb   : > { %v486_v28 = vpack.c.bf16 %v422_v51, %v422_v51  ;;  %v2541_v41 = vcvt.s32.f32 %v813_v38  ;;  %v2574_v51 = vcvt.s32.f32 %v798_v36 }
  0xdc   : > { %v522_v42 = vunpack.c.l.bf16 %v488_v48  ;;  %v2546_v37 = vcvt.s32.f32 %v783_v61  ;;  %v521_v31 = vunpack.c.l.bf16 %v487_v5 }
  0xdd   : > { %v520_v49 = vunpack.c.l.bf16 %v486_v28  ;;  %816 = vmin.xlane.f32.xlu0 %v2541_v41 }
  0xde   : > { %vm554_vm2 = vcmp.eq.f32.partialorder %v1881_v56, %v522_v42  ;;  %756 = vmin.xlane.f32.xlu1 %v2538_v21  ;;  %786 = vmin.xlane.f32.xlu2 %v2546_v37  ;;  %vm2555_vm3 = vcmp.eq.f32.partialorder %v1880_v57, %v521_v31 }
  0xdf   : > { %vm552_vm4 = vcmp.eq.f32.partialorder %v1877_v58, %v520_v49  ;;  %v586_v50 = vsel %vm554_vm2, %v2379_v11, 32  ;;  %v585_v55 = vsel %vm2555_vm3, %v2379_v11, 32 }
  0xe0   : > { %v2564_v38 = vsel %vm374_vm1, %v586_v50, 2147483647  ;;  %v584_v56 = vsel %vm552_vm4, %v2379_v11, 32  ;;  %v2580_v49 = vsel %vm374_vm1, %v585_v55, 2147483647 }
  0xe1   : > { %v437_v57 = vpop.xlane.xlu2 %436  ;;  %v858_v31 = vshra.s32 %v2564_v38, 16  ;;  %v2572_v43 = vsel %vm374_vm1, %v584_v56, 2147483647  ;;  %v434_v48 = vpop.xlane.xlu1 %433  ;;  %v843_v55 = vshra.s32 %v2580_v49, 16 }
  0xe2   : > { %v491_v47 = vpack.c.bf16 %v437_v57, %v437_v57  ;;  %v431_v58 = vpop.xlane.xlu0 %430  ;;  %v828_v61 = vshra.s32 %v2572_v43, 16  ;;  %v490_v5 = vpack.c.bf16 %v434_v48, %v434_v48 }
  0xe3   : > { %v489_v28 = vpack.c.bf16 %v431_v58, %v431_v58  ;;  %v2577_v42 = vcvt.s32.f32 %v858_v31 }
  0xe4   : > { %v525_v40 = vunpack.c.l.bf16 %v491_v47  ;;  %v2582_v50 = vcvt.s32.f32 %v828_v61  ;;  %v524_v23 = vunpack.c.l.bf16 %v490_v5  ;;  %v2610_v61 = vcvt.s32.f32 %v843_v55 }
  0xe5   : > { %v523_v56 = vunpack.c.l.bf16 %v489_v28  ;;  %861 = vmin.xlane.f32.xlu0 %v2577_v42 }
  0xe6   : > { %vm557_vm5 = vcmp.eq.f32.partialorder %v1888_v0, %v525_v40  ;;  %801 = vmin.xlane.f32.xlu1 %v2574_v51  ;;  %831 = vmin.xlane.f32.xlu2 %v2582_v50  ;;  %vm2591_vm6 = vcmp.eq.f32.partialorder %v1885_v1, %v524_v23 }
  0xe7   : > { %vm555_vm7 = vcmp.eq.f32.partialorder %v1884_v2, %v523_v56  ;;  %v589_v57 = vsel %vm557_vm5, %v2379_v11, 32  ;;  %v588_v48 = vsel %vm2591_vm6, %v2379_v11, 32 }
  0xe8   : > { %v2600_v31 = vsel %vm374_vm1, %v589_v57, 2147483647  ;;  %v587_v0 = vsel %vm555_vm7, %v2379_v11, 32  ;;  %v2616_v36 = vsel %vm374_vm1, %v588_v48, 2147483647 }
  0xe9   : > { %v446_v1 = vpop.xlane.xlu2 %445  ;;  %v903_v23 = vshra.s32 %v2600_v31, 16  ;;  %v2608_v47 = vsel %vm374_vm1, %v587_v0, 2147483647  ;;  %v443_v58 = vpop.xlane.xlu1 %442  ;;  %v888_v48 = vshra.s32 %v2616_v36, 16 }
  0xea   : > { %v494_v63 = vpack.c.bf16 %v446_v1, %v446_v1  ;;  %v440_v2 = vpop.xlane.xlu0 %439  ;;  %v873_v5 = vshra.s32 %v2608_v47, 16  ;;  %v493_v28 = vpack.c.bf16 %v443_v58, %v443_v58 }
  0xeb   : > { %v492_v40 = vpack.c.bf16 %v440_v2, %v440_v2  ;;  %v2613_v56 = vcvt.s32.f32 %v903_v23  ;;  %v2646_v2 = vcvt.s32.f32 %v888_v48  ;;  %v3683_v48 = vunpack.c.h.bf16 %v2338_v14 }
  0xec   : > { %v528_v57 = vunpack.c.l.bf16 %v494_v63  ;;  %v2618_v16 = vcvt.s32.f32 %v873_v5  ;;  %v527_v15 = vunpack.c.l.bf16 %v493_v28 }
  0xed   : > { %v526_v0 = vunpack.c.l.bf16 %v492_v40  ;;  %906 = vmin.xlane.f32.xlu0 %v2613_v56  ;;  %3678 = vst [vmem:[#allocation9_spill] sm:$0xff] %v2646_v2 }
  0xee   : > { %vm560_vm8 = vcmp.eq.f32.partialorder %v1893_v7, %v528_v57  ;;  %846 = vmin.xlane.f32.xlu1 %v2610_v61  ;;  %876 = vmin.xlane.f32.xlu2 %v2618_v16  ;;  %vm2627_vm9 = vcmp.eq.f32.partialorder %v1892_v8, %v527_v15 }
  0xef   : > { %vm558_vm10 = vcmp.eq.f32.partialorder %v1889_v9, %v526_v0  ;;  %v592_v1 = vsel %vm560_vm8, %v2379_v11, 32  ;;  %v591_v6 = vsel %vm2627_vm9, %v2379_v11, 32 }
  0xf0   : > { %v2636_v23 = vsel %vm374_vm1, %v592_v1, 2147483647  ;;  %v590_v7 = vsel %vm558_vm10, %v2379_v11, 32  ;;  %v2652_v0 = vsel %vm374_vm1, %v591_v6, 2147483647 }
  0xf1   : > { %3677 = vst [vmem:[#allocation8_spill] sm:$0xff] %v2636_v23  ;;  %v455_v8 = vpop.xlane.xlu2 %454  ;;  %v948_v15 = vshra.s32 %v2636_v23, 16  ;;  %v2644_v58 = vsel %vm374_vm1, %v590_v7, 2147483647  ;;  %v452_v63 = vpop.xlane.xlu1 %451  ;;  %v933_v6 = vshra.s32 %v2652_v0, 16 }
  0xf2   : > { %v497_v62 = vpack.c.bf16 %v455_v8, %v455_v8  ;;  %v449_v9 = vpop.xlane.xlu0 %448  ;;  %v918_v5 = vshra.s32 %v2644_v58, 16  ;;  %v496_v28 = vpack.c.bf16 %v452_v63, %v452_v63  ;;  %3680 = vst [vmem:[#allocation11_spill] sm:$0xff] %v2652_v0  ;;  %v3682_v8 = vunpack.c.l.bf16 %v2335_v13 }
  0xf3   : > { %v495_v40 = vpack.c.bf16 %v449_v9, %v449_v9  ;;  %v2649_v57 = vcvt.s32.f32 %v948_v15  ;;  %v3686_v63 = vunpack.c.l.bf16 %v2338_v14 }
  0xf4   : > { %v531_v55 = vunpack.c.l.bf16 %v497_v62  ;;  %v2654_v1 = vcvt.s32.f32 %v918_v5  ;;  %v530_v23 = vunpack.c.l.bf16 %v496_v28 }
  0xf5   : > { %3679 = vst [vmem:[#allocation10_spill] sm:$0xff] %v2649_v57  ;;  %v529_v7 = vunpack.c.l.bf16 %v495_v40  ;;  %951 = vmin.xlane.f32.xlu0 %v2649_v57 }
  0xf6   : > { %3681 = vst [vmem:[#allocation12_spill] sm:$0xff] %v2654_v1  ;;  %vm563_vm11 = vcmp.eq.f32.partialorder %v3682_v8, %v531_v55  ;;  %891 = vmin.xlane.f32.xlu1 %v2646_v2  ;;  %921 = vmin.xlane.f32.xlu2 %v2654_v1  ;;  %vm2663_vm12 = vcmp.eq.f32.partialorder %v3683_v48, %v530_v23  ;;  %v2682_v48 = vcvt.s32.f32 %v933_v6  ;;  %v3690_v6 = vunpack.c.l.bf16 %v2353_v30 }
  0xf7   : > { %vm561_vm13 = vcmp.eq.f32.partialorder %v3686_v63, %v529_v7  ;;  %v595_v62 = vsel %vm563_vm11, %v2379_v11, 32  ;;  %v594_v28 = vsel %vm2663_vm12, %v2379_v11, 32 }
  0xf8   : > { %v2672_v9 = vsel %vm374_vm1, %v595_v62, 2147483647  ;;  %v593_v5 = vsel %vm561_vm13, %v2379_v11, 32  ;;  %v2688_v15 = vsel %vm374_vm1, %v594_v28, 2147483647 }
  0xf9   : > { %3687 = vst [vmem:[#allocation13_spill] sm:$0xff] %v2672_v9  ;;  %v464_v23 = vpop.xlane.xlu2 %463  ;;  %v993_v40 = vshra.s32 %v2672_v9, 16  ;;  %v2680_v55 = vsel %vm374_vm1, %v593_v5, 2147483647  ;;  %v461_v8 = vpop.xlane.xlu1 %460  ;;  %v978_v28 = vshra.s32 %v2688_v15, 16 }
  0xfa   : > { %v500_v14 = vpack.c.bf16 %v464_v23, %v464_v23  ;;  %v458_v7 = vpop.xlane.xlu0 %457  ;;  %v963_v63 = vshra.s32 %v2680_v55, 16  ;;  %v499_v62 = vpack.c.bf16 %v461_v8, %v461_v8  ;;  %3688 = vst [vmem:[#allocation14_spill] sm:$0xff] %v2688_v15  ;;  %v3689_v23 = vunpack.c.h.bf16 %v2353_v30 }
  0xfb   : > { %v498_v0 = vpack.c.bf16 %v458_v7, %v458_v7  ;;  %v2685_v2 = vcvt.s32.f32 %v993_v40  ;;  %v3693_v8 = vunpack.c.h.bf16 %v2335_v13  ;;  %v2718_v13 = vcvt.s32.f32 %v978_v28 }
  0xfc   : > { %v534_v1 = vunpack.c.l.bf16 %v500_v14  ;;  %v2690_v57 = vcvt.s32.f32 %v963_v63  ;;  %v533_v9 = vunpack.c.l.bf16 %v499_v62  ;;  %v3695_v28 = vunpack.c.h.bf16 %v2368_v46 }
  0xfd   : > { %v532_v5 = vunpack.c.l.bf16 %v498_v0  ;;  %996 = vmin.xlane.f32.xlu0 %v2685_v2 }
  0xfe   : > { %vm566_vm14 = vcmp.eq.f32.partialorder %v3689_v23, %v534_v1  ;;  %936 = vmin.xlane.f32.xlu1 %v2682_v48  ;;  %966 = vmin.xlane.f32.xlu2 %v2690_v57  ;;  %vm2699_vm15 = vcmp.eq.f32.partialorder %v3690_v6, %v533_v9 }
  0xff   : > { %vm564_vm0 = vcmp.eq.f32.partialorder %v3693_v8, %v532_v5  ;;  %v598_v0 = vsel %vm566_vm14, %v2379_v11, 32  ;;  %v597_v30 = vsel %vm2699_vm15, %v2379_v11, 32 }
 0x100   : > { %v2708_v14 = vsel %vm374_vm1, %v598_v0, 2147483647  ;;  %v596_v1 = vsel %vm564_vm0, %v2379_v11, 32  ;;  %v2724_v0 = vsel %vm374_vm1, %v597_v30, 2147483647 }
 0x101   : > { %3694 = vst [vmem:[#allocation15_spill] sm:$0xff] %v2708_v14  ;;  %v1038_v9 = vshra.s32 %v2708_v14, 16  ;;  %v2716_v7 = vsel %vm374_vm1, %v596_v1, 2147483647  ;;  %v470_v63 = vpop.xlane.xlu1 %469  ;;  %v1023_v1 = vshra.s32 %v2724_v0, 16 }
 0x102   : > { %v467_v62 = vpop.xlane.xlu0 %466  ;;  %v1008_v5 = vshra.s32 %v2716_v7, 16  ;;  %v502_v23 = vpack.c.bf16 %v470_v63, %v470_v63 }
 0x103   : > { %v501_v6 = vpack.c.bf16 %v467_v62, %v467_v62  ;;  %v2721_v8 = vcvt.s32.f32 %v1038_v9  ;;  %v3696_v9 = vunpack.c.l.bf16 %v2368_v46 }
 0x104   : > { %v2726_v40 = vcvt.s32.f32 %v1008_v5  ;;  %v536_v15 = vunpack.c.l.bf16 %v502_v23  ;;  %v2741_v5 = vcvt.s32.f32 %v1023_v1  ;;  %v602_v1 = vand.u32 65535, %v2392_v3 }
 0x105   : > { %v535_v14 = vunpack.c.l.bf16 %v501_v6  ;;  %1041 = vmin.xlane.f32.xlu0 %v2721_v8  ;;  %v617_v3 = vand.u32 65535, %v2425_v19  ;;  %v662_v19 = vand.u32 65535, %v2439_v27 }
 0x106   : > { %981 = vmin.xlane.f32.xlu1 %v2718_v13  ;;  %1011 = vmin.xlane.f32.xlu2 %v2726_v40  ;;  %vm568_vm2 = vcmp.eq.f32.partialorder %v3695_v28, %v536_v15  ;;  %v632_v28 = vand.u32 65535, %v2387_v39  ;;  %v647_v39 = vand.u32 65535, %v2419_v18  ;;  %v692_v18 = vand.u32 65535, %v2464_v59 }
 0x107   : > { %vm567_vm3 = vcmp.eq.f32.partialorder %v3696_v9, %v535_v14  ;;  %v600_v63 = vsel %vm568_vm2, %v2379_v11, 32 }
 0x108   : > { %v599_v30 = vsel %vm567_vm3, %v2379_v11, 32  ;;  %v2745_v6 = vsel %vm374_vm1, %v600_v63, 2147483647 }
 0x109   : > { %v2739_v62 = vsel %vm374_vm1, %v599_v30, 2147483647  ;;  %3697 = vst [vmem:[#allocation16_spill] sm:$0xff] %v2745_v6  ;;  %v1068_v46 = vshra.s32 %v2745_v6, 16  ;;  %v634_v30 = vcvt.s32.f32 %v632_v28 }
 0x10a   : > { %v1053_v23 = vshra.s32 %v2739_v62, 16 }
 0x10b   : > { %v2752_v14 = vcvt.s32.f32 %v1068_v46 }
 0x10c   : > { %v2747_v15 = vcvt.s32.f32 %v1053_v23  ;;  %v604_v23 = vcvt.s32.f32 %v602_v1 }
 0x10d   : > { %3699 = vst [vmem:[#allocation18_spill] sm:$0xff] %v2752_v14 }
 0x10e   : > { %3698 = vst [vmem:[#allocation17_spill] sm:$0xff] %v2747_v15  ;;  %1026 = vmin.xlane.f32.xlu1 %v2741_v5  ;;  %1056 = vmin.xlane.f32.xlu2 %v2747_v15 }
 0x116   : > { %1071 = vmin.xlane.f32.xlu1 %v2752_v14  ;;  %v677_v14 = vand.u32 65535, %v2416_v26 }
 0x118   : > { %v679_v15 = vcvt.s32.f32 %v677_v14  ;;  %v722_v14 = vand.u32 65535, %v2455_v20 }
 0x130   : > { %v2757_v9 = vpop.xlane.xlu0 %636 }
 0x131   : > { %3700 = vst [vmem:[#allocation19_spill] sm:$0xff] %v2757_v9  ;;  %v2759_v63 = vpop.xlane.xlu2 %606  ;;  %vm638_vm1 = vcmp.eq.f32.partialorder %v2395_v12, %v2757_v9  ;;  %v649_v12 = vcvt.s32.f32 %v647_v39  ;;  %v619_v9 = vcvt.s32.f32 %v617_v3  ;;  %v767_v39 = vand.u32 65535, %v2492_v53 }
 0x132   : > { %vm608_vm4 = vcmp.eq.f32.partialorder %v2397_v60, %v2759_v63  ;;  %v639_v46 = vsel %vm638_vm1, %v634_v30, inf }
 0x133   : > { %v609_v11 = vsel %vm608_vm4, %v604_v23, inf  ;;  %640 = vmin.xlane.f32.xlu1 %v639_v46  ;;  %v694_v23 = vcvt.s32.f32 %v692_v18  ;;  %v724_v46 = vcvt.s32.f32 %v722_v14  ;;  %v812_v18 = vand.u32 65535, %v2528_v52 }
 0x134   : > { %610 = vmin.xlane.f32.xlu0 %v609_v11 }
 0x138   : > { %v2768_v28 = vpop.xlane.xlu0 %681 }
 0x139   : > { %v2770_v6 = vpop.xlane.xlu2 %651  ;;  %v2772_v1 = vpop.xlane.xlu1 %621  ;;  %vm683_vm5 = vcmp.eq.f32.partialorder %v2431_v22, %v2768_v28 }
 0x13a   : > { %vm653_vm6 = vcmp.eq.f32.partialorder %v2433_v10, %v2770_v6  ;;  %vm623_vm7 = vcmp.eq.f32.partialorder %v2435_v29, %v2772_v1  ;;  %v684_v26 = vsel %vm683_vm5, %v679_v15, inf  ;;  %v664_v29 = vcvt.s32.f32 %v662_v19 }
 0x13b   : > { %v654_v60 = vsel %vm653_vm6, %v649_v12, inf  ;;  %v624_v11 = vsel %vm623_vm7, %v619_v9, inf  ;;  %685 = vmin.xlane.f32.xlu1 %v684_v26  ;;  %v737_v15 = vand.u32 65535, %v2500_v33  ;;  %v707_v9 = vand.u32 65535, %v2470_v44 }
 0x13c   : > { %655 = vmin.xlane.f32.xlu0 %v654_v60  ;;  %625 = vmin.xlane.f32.xlu2 %v624_v11  ;;  %v769_v60 = vcvt.s32.f32 %v767_v39  ;;  %v782_v11 = vand.u32 65535, %v2536_v32  ;;  %v752_v26 = vand.u32 65535, %v2508_v54  ;;  %v842_v39 = vand.u32 65535, %v2580_v49 }
 0x13d   : > { %v739_v12 = vcvt.s32.f32 %v737_v15 }
 0x13e   : > { %v784_v14 = vcvt.s32.f32 %v782_v11  ;;  %v3701_v11 = vld [vmem:[#allocation8_spill] sm:$0xff] }
 0x140   : > { %v2783_v30 = vpop.xlane.xlu0 %726 }
 0x141   : > { %v2785_v22 = vpop.xlane.xlu1 %666  ;;  %v2787_v10 = vpop.xlane.xlu2 %696  ;;  %vm728_vm8 = vcmp.eq.f32.partialorder %v2467_v24, %v2783_v30 }
 0x142   : > { %vm698_vm9 = vcmp.eq.f32.partialorder %v2474_v17, %v2787_v10  ;;  %vm668_vm10 = vcmp.eq.f32.partialorder %v2472_v25, %v2785_v22  ;;  %v729_v59 = vsel %vm728_vm8, %v724_v46, inf  ;;  %v709_v25 = vcvt.s32.f32 %v707_v9 }
 0x143   : > { %v699_v27 = vsel %vm698_vm9, %v694_v23, inf  ;;  %v669_v20 = vsel %vm668_vm10, %v664_v29, inf  ;;  %730 = vmin.xlane.f32.xlu1 %v729_v59  ;;  %v814_v23 = vcvt.s32.f32 %v812_v18  ;;  %v827_v29 = vand.u32 65535, %v2572_v43 }
 0x144   : > { %700 = vmin.xlane.f32.xlu0 %v699_v27  ;;  %670 = vmin.xlane.f32.xlu2 %v669_v20  ;;  %v797_v46 = vand.u32 65535, %v2544_v34  ;;  %v857_v27 = vand.u32 65535, %v2564_v38  ;;  %v872_v9 = vand.u32 65535, %v2608_v47 }
 0x145   : > { %v829_v59 = vcvt.s32.f32 %v827_v29  ;;  %v962_v29 = vand.u32 65535, %v2680_v55 }
 0x146   : > { %v859_v15 = vcvt.s32.f32 %v857_v27 }
 0x148   : > { %v2798_v3 = vpop.xlane.xlu0 %771 }
 0x149   : > { %v2800_v24 = vpop.xlane.xlu1 %711  ;;  %v2802_v17 = vpop.xlane.xlu2 %741  ;;  %vm773_vm11 = vcmp.eq.f32.partialorder %v2505_v45, %v2798_v3 }
 0x14a   : > { %vm743_vm12 = vcmp.eq.f32.partialorder %v2510_v35, %v2802_v17  ;;  %vm713_vm13 = vcmp.eq.f32.partialorder %v2502_v4, %v2800_v24  ;;  %v774_v33 = vsel %vm773_vm11, %v769_v60, inf  ;;  %v754_v4 = vcvt.s32.f32 %v752_v26 }
 0x14b   : > { %v744_v44 = vsel %vm743_vm12, %v739_v12, inf  ;;  %v714_v53 = vsel %vm713_vm13, %v709_v25, inf  ;;  %775 = vmin.xlane.f32.xlu1 %v774_v33  ;;  %v902_v12 = vand.u32 65535, %v2600_v31  ;;  %v874_v60 = vcvt.s32.f32 %v872_v9 }
 0x14c   : > { %745 = vmin.xlane.f32.xlu0 %v744_v44  ;;  %715 = vmin.xlane.f32.xlu2 %v714_v53  ;;  %v917_v53 = vand.u32 65535, %v2644_v58  ;;  %v887_v33 = vand.u32 65535, %v2616_v36  ;;  %v947_v26 = vand.u32 65535, %v3701_v11  ;;  %v3704_v58 = vld [vmem:[#allocation9_spill] sm:$0xff] }
 0x14d   : > { %v904_v44 = vcvt.s32.f32 %v902_v12 }
 0x150   : > { %v2813_v19 = vpop.xlane.xlu0 %816 }
 0x151   : > { %v2815_v45 = vpop.xlane.xlu1 %756  ;;  %v2817_v35 = vpop.xlane.xlu2 %786  ;;  %vm818_vm14 = vcmp.eq.f32.partialorder %v2541_v41, %v2813_v19 }
 0x152   : > { %vm788_vm15 = vcmp.eq.f32.partialorder %v2546_v37, %v2817_v35  ;;  %vm758_vm0 = vcmp.eq.f32.partialorder %v2538_v21, %v2815_v45  ;;  %v819_v32 = vsel %vm818_vm14, %v814_v23, inf  ;;  %v799_v21 = vcvt.s32.f32 %v797_v46  ;;  %v3702_v23 = vld [vmem:[#allocation10_spill] sm:$0xff]  ;;  %v3705_v46 = vld [vmem:[#allocation11_spill] sm:$0xff] }
 0x153   : > { %v789_v54 = vsel %vm788_vm15, %v784_v14, inf  ;;  %v759_v52 = vsel %vm758_vm0, %v754_v4, inf  ;;  %820 = vmin.xlane.f32.xlu1 %v819_v32  ;;  %v919_v14 = vcvt.s32.f32 %v917_v53  ;;  %v949_v4 = vcvt.s32.f32 %v947_v26 }
 0x154   : > { %790 = vmin.xlane.f32.xlu0 %v789_v54  ;;  %760 = vmin.xlane.f32.xlu2 %v759_v52  ;;  %v3703_v54 = vld [vmem:[#allocation12_spill] sm:$0xff]  ;;  %v932_v27 = vand.u32 65535, %v3705_v46 }
 0x156   : > { %v934_v9 = vcvt.s32.f32 %v932_v27  ;;  %v613_v27 = vcvt.f32.s32 %v2759_v63 }
 0x158   : > { %v2828_v20 = vpop.xlane.xlu0 %861 }
 0x159   : > { %v2830_v41 = vpop.xlane.xlu1 %801  ;;  %v2832_v37 = vpop.xlane.xlu2 %831  ;;  %vm863_vm2 = vcmp.eq.f32.partialorder %v2577_v42, %v2828_v20 }
 0x15a   : > { %vm833_vm3 = vcmp.eq.f32.partialorder %v2582_v50, %v2832_v37  ;;  %vm803_vm1 = vcmp.eq.f32.partialorder %v2574_v51, %v2830_v41  ;;  %v864_v43 = vsel %vm863_vm2, %v859_v15, inf  ;;  %v844_v51 = vcvt.s32.f32 %v842_v39 }
 0x15b   : > { %v834_v34 = vsel %vm833_vm3, %v829_v59, inf  ;;  %v804_v38 = vsel %vm803_vm1, %v799_v21, inf  ;;  %865 = vmin.xlane.f32.xlu1 %v864_v43  ;;  %v3706_v59 = vld [vmem:[#allocation13_spill] sm:$0xff]  ;;  %v964_v43 = vcvt.s32.f32 %v962_v29  ;;  %v3711_v29 = vld [vmem:[#allocation18_spill] sm:$0xff]  ;;  %vm1730_vm1 = vcmask 7175  }
 0x15c   : > { %835 = vmin.xlane.f32.xlu0 %v834_v34  ;;  %805 = vmin.xlane.f32.xlu2 %v804_v38  ;;  %v992_v21 = vand.u32 65535, %v3706_v59 }
 0x15e   : > { %v994_v39 = vcvt.s32.f32 %v992_v21  ;;  %v614_v21 = vshll.u32 %v613_v27, 16 }
 0x160   : > { %v2843_v25 = vpop.xlane.xlu0 %906 }
 0x161   : > { %v2845_v42 = vpop.xlane.xlu1 %846  ;;  %v2847_v50 = vpop.xlane.xlu2 %876  ;;  %vm908_vm4 = vcmp.eq.f32.partialorder %v2613_v56, %v2843_v25 }
 0x162   : > { %vm878_vm5 = vcmp.eq.f32.partialorder %v2618_v16, %v2847_v50  ;;  %vm848_vm6 = vcmp.eq.f32.partialorder %v2610_v61, %v2845_v42  ;;  %v909_v47 = vsel %vm908_vm4, %v904_v44, inf  ;;  %v889_v61 = vcvt.s32.f32 %v887_v33  ;;  %v3707_v44 = vld [vmem:[#allocation14_spill] sm:$0xff] }
 0x163   : > { %v879_v49 = vsel %vm878_vm5, %v874_v60, inf  ;;  %v849_v31 = vsel %vm848_vm6, %v844_v51, inf  ;;  %910 = vmin.xlane.f32.xlu1 %v909_v47  ;;  %v1007_v51 = vand.u32 65535, %v2716_v7  ;;  %vm1084_vm4 = vcmask 130112  }
 0x164   : > { %880 = vmin.xlane.f32.xlu0 %v879_v49  ;;  %850 = vmin.xlane.f32.xlu2 %v849_v31  ;;  %v977_v49 = vand.u32 65535, %v3707_v44  ;;  %v3708_v31 = vld [vmem:[#allocation15_spill] sm:$0xff]  ;;  %vm1088_vm5 = vcmask 195712   ;;  %vm3659_vm6 = vcmask 261312  }
 0x165   : > { %v1037_v47 = vand.u32 65535, %v3708_v31  ;;  %v1009_v33 = vcvt.s32.f32 %v1007_v51 }
 0x167   : > { %v1039_v11 = vcvt.s32.f32 %v1037_v47 }
 0x168   : > { %v2858_v18 = vpop.xlane.xlu0 %951 }
 0x169   : > { %v2860_v56 = vpop.xlane.xlu1 %891  ;;  %v2862_v16 = vpop.xlane.xlu2 %921  ;;  %vm953_vm7 = vcmp.eq.f32.partialorder %v3702_v23, %v2858_v18 }
 0x16a   : > { %vm923_vm8 = vcmp.eq.f32.partialorder %v3703_v54, %v2862_v16  ;;  %vm893_vm9 = vcmp.eq.f32.partialorder %v3704_v58, %v2860_v56  ;;  %v954_v32 = vsel %vm953_vm7, %v949_v4, inf  ;;  %v1052_v4 = vand.u32 65535, %v2739_v62 }
 0x16b   : > { %v924_v36 = vsel %vm923_vm8, %v919_v14, inf  ;;  %v894_v52 = vsel %vm893_vm9, %v889_v61, inf  ;;  %955 = vmin.xlane.f32.xlu1 %v954_v32  ;;  %v1022_v61 = vand.u32 65535, %v2724_v0  ;;  %vm3658_vm7 = vcmask 326912  }
 0x16c   : > { %925 = vmin.xlane.f32.xlu0 %v924_v36  ;;  %895 = vmin.xlane.f32.xlu2 %v894_v52  ;;  %v1054_v58 = vcvt.s32.f32 %v1052_v4  ;;  %v3710_v52 = vld [vmem:[#allocation16_spill] sm:$0xff]  ;;  %vm3657_vm8 = vcmask 392512   ;;  %vm3656_vm9 = vcmask 458112  }
 0x16d   : > { %v1067_v0 = vand.u32 65535, %v3710_v52 }
 0x16f   : > { %v1069_v62 = vcvt.s32.f32 %v1067_v0  ;;  %v673_v0 = vcvt.f32.s32 %v2785_v22  ;;  %v823_v22 = vcvt.f32.s32 %v2813_v19 }
 0x170   : > { %v2873_v15 = vpop.xlane.xlu0 %996 }
 0x171   : > { %v2875_v34 = vpop.xlane.xlu1 %936  ;;  %v2877_v38 = vpop.xlane.xlu2 %966  ;;  %vm998_vm10 = vcmp.eq.f32.partialorder %v2685_v2, %v2873_v15 }
 0x172   : > { %vm968_vm11 = vcmp.eq.f32.partialorder %v2690_v57, %v2877_v38  ;;  %vm938_vm12 = vcmp.eq.f32.partialorder %v2682_v48, %v2875_v34  ;;  %v999_v60 = vsel %vm998_vm10, %v994_v39, inf  ;;  %v979_v48 = vcvt.s32.f32 %v977_v49 }
 0x173   : > { %v969_v55 = vsel %vm968_vm11, %v964_v43, inf  ;;  %v939_v12 = vsel %vm938_vm12, %v934_v9, inf  ;;  %1000 = vmin.xlane.f32.xlu1 %v999_v60  ;;  %v658_v39 = vcvt.f32.s32 %v2770_v6  ;;  %vm3655_vm10 = vcmask 523712  }
 0x174   : > { %970 = vmin.xlane.f32.xlu0 %v969_v55  ;;  %940 = vmin.xlane.f32.xlu2 %v939_v12  ;;  %v628_v55 = vcvt.f32.s32 %v2772_v1  ;;  %vm3654_vm11 = vcmask 589312   ;;  %vm3653_vm12 = vcmask 654912  }
 0x175   : > { %v659_v51 = vshll.u32 %v658_v39, 16 }
 0x176   : > { %v629_v44 = vshll.u32 %v628_v55, 16  ;;  %v793_v55 = vcvt.f32.s32 %v2817_v35  ;;  %v913_v35 = vcvt.f32.s32 %v2843_v25  ;;  %v943_v25 = vcvt.f32.s32 %v2875_v34  ;;  %v3715_v34 = vld [vmem:[#allocation7_spill] sm:$0xff] }
 0x178   : > { %v2888_v53 = vpop.xlane.xlu0 %1041 }
 0x179   : > { %v2890_v2 = vpop.xlane.xlu1 %981  ;;  %v2892_v57 = vpop.xlane.xlu2 %1011  ;;  %vm1043_vm13 = vcmp.eq.f32.partialorder %v2721_v8, %v2888_v53  ;;  %v1024_v8 = vcvt.s32.f32 %v1022_v61 }
 0x17a   : > { %vm1013_vm14 = vcmp.eq.f32.partialorder %v2726_v40, %v2892_v57  ;;  %vm983_vm15 = vcmp.eq.f32.partialorder %v2718_v13, %v2890_v2  ;;  %v1044_v14 = vsel %vm1043_vm13, %v1039_v11, inf  ;;  %v3709_v13 = vld [vmem:[#allocation17_spill] sm:$0xff]  ;;  %vm3652_vm13 = vcmask 720512  }
 0x17b   : > { %v1014_v7 = vsel %vm1013_vm14, %v1009_v33, inf  ;;  %v984_v26 = vsel %vm983_vm15, %v979_v48, inf  ;;  %1045 = vmin.xlane.f32.xlu1 %v1044_v14  ;;  %vm3651_vm14 = vcmask 786112   ;;  %vm3646_vm15 = vcmask 851712  }
 0x17c   : > { %1015 = vmin.xlane.f32.xlu0 %v1014_v7  ;;  %985 = vmin.xlane.f32.xlu2 %v984_v26 }
 0x181   : > { %v2902_v23 = vpop.xlane.xlu1 %1026  ;;  %v2904_v54 = vpop.xlane.xlu2 %1056 }
 0x182   : > { %vm1028_vm0 = vcmp.eq.f32.partialorder %v2741_v5, %v2902_v23  ;;  %vm1058_vm2 = vcmp.eq.f32.partialorder %v3709_v13, %v2904_v54  ;;  %v838_v13 = vcvt.f32.s32 %v2832_v37 }
 0x183   : > { %v1029_v40 = vsel %vm1028_vm0, %v1024_v8, inf  ;;  %v1059_v36 = vsel %vm1058_vm2, %v1054_v58, inf  ;;  %v3714_v8 = vld [vmem:[#allocation19_spill] sm:$0xff]  ;;  %vm3647_vm0 = vcmask 917312   ;;  %vm3650_vm2 = vcmask 982912  }
 0x184   : > { %1030 = vmin.xlane.f32.xlu2 %v1029_v40  ;;  %1060 = vmin.xlane.f32.xlu0 %v1059_v36  ;;  %v643_v58 = vcvt.f32.s32 %v3714_v8  ;;  %v688_v40 = vcvt.f32.s32 %v2768_v28  ;;  %v733_v36 = vcvt.f32.s32 %v2783_v30  ;;  %v839_v37 = vshll.u32 %v838_v13, 16 }
 0x185   : > { %v898_v8 = vcvt.f32.s32 %v2860_v56 }
 0x186   : > { %v2950_v52 = vshll.u32 %v643_v58, 16  ;;  %v2961_v30 = vshll.u32 %v688_v40, 16  ;;  %v2963_v39 = vshll.u32 %v733_v36, 16  ;;  %v958_v58 = vcvt.f32.s32 %v2858_v18 }
 0x187   : > { %v928_v36 = vcvt.f32.s32 %v2862_v16  ;;  %v988_v18 = vcvt.f32.s32 %v2890_v2  ;;  %v3019_v2 = vshll.u32 %v943_v25, 16 }
 0x189   : > { %v2911_v32 = vpop.xlane.xlu1 %1071 }
 0x18a   : > { %vm1073_vm3 = vcmp.eq.f32.partialorder %v3711_v29, %v2911_v32  ;;  %v778_v29 = vcvt.f32.s32 %v2798_v3  ;;  %v763_v3 = vcvt.f32.s32 %v2815_v45  ;;  %v853_v45 = vcvt.f32.s32 %v2845_v42 }
 0x18b   : > { %v1074_v46 = vsel %vm1073_vm3, %v1069_v62, inf  ;;  %v703_v62 = vcvt.f32.s32 %v2787_v10  ;;  %v2966_v10 = vld [vmem:[#allocation2] sm:$0x3]  ;;  %vm1732_vm3 = vcmask 0  }
 0x18c   : > { %1075 = vmin.xlane.f32.xlu2 %v1074_v46  ;;  %v2992_v13 = vshll.u32 %v763_v3, 16  ;;  %v854_v56 = vshll.u32 %v853_v45, 16  ;;  %v3026_v45 = vshll.u32 %v988_v18, 16 }
 0x1a6   : > { %v2916_v5 = vpop.xlane.xlu1 %640 }
 0x1a7   : > { %v611_v59 = vpop.xlane.xlu0 %610  ;;  %v642_v3 = vcvt.f32.s32 %v2916_v5 }
 0x1a8   : > { %v612_v43 = vcvt.f32.s32 %v611_v59  ;;  %v718_v59 = vcvt.f32.s32 %v2800_v24  ;;  %v868_v24 = vcvt.f32.s32 %v2828_v20  ;;  %v2987_v20 = vshll.u32 %v823_v22, 16 }
 0x1a9   : > { %v3011_v22 = vadd.s32 4294967288, %v3715_v34 }
 0x1aa   : > { %v2918_v9 = vadd.s32 %v614_v21, %v612_v43  ;;  %v748_v21 = vcvt.f32.s32 %v2802_v17  ;;  %v2980_v19 = vshll.u32 %v718_v59, 16  ;;  %v869_v40 = vshll.u32 %v868_v24, 16 }
 0x1ab   : > { %v1018_v59 = vcvt.f32.s32 %v2892_v57  ;;  %3716 = vst [vmem:[#allocation12_spill] sm:$0xff] %v3011_v22 }
 0x1ac   : > { %3712 = vst [vmem:[#allocation8_spill] sm:$0xff] %v2918_v9 }
 0x1ae   : > { %v2922_v31 = vpop.xlane.xlu1 %685 }
 0x1af   : > { %v626_v12 = vpop.xlane.xlu2 %625  ;;  %v656_v60 = vpop.xlane.xlu0 %655  ;;  %v687_v18 = vcvt.f32.s32 %v2922_v31 }
 0x1b0   : > { %v627_v49 = vcvt.f32.s32 %v626_v12  ;;  %v657_v47 = vcvt.f32.s32 %v656_v60  ;;  %v2973_v12 = vshll.u32 %v673_v0, 16  ;;  %v2975_v60 = vshll.u32 %v703_v62, 16 }
 0x1b1   : > { %v973_v0 = vcvt.f32.s32 %v2877_v38  ;;  %v1003_v62 = vcvt.f32.s32 %v2873_v15  ;;  %v3013_v38 = vshll.u32 %v928_v36, 16  ;;  %v3016_v15 = vadd.s32 4294967280, %v3715_v34 }
 0x1b2   : > { %v2924_v63 = vadd.s32 %v629_v44, %v627_v49  ;;  %v2926_v33 = vadd.s32 %v659_v51, %v657_v47  ;;  %v2977_v51 = vshll.u32 %v778_v29, 16  ;;  %v808_v44 = vcvt.f32.s32 %v2830_v41 }
 0x1b3   : > { %v2982_v49 = vshll.u32 %v748_v21, 16  ;;  %v883_v47 = vcvt.f32.s32 %v2847_v50  ;;  %v2994_v41 = vshll.u32 %v793_v55, 16  ;;  %3717 = vst [vmem:[#allocation9_spill] sm:$0xff] %v3016_v15  ;;  %v3021_v57 = vshll.u32 %v973_v0, 16 }
 0x1b4   : > { %3713 = vst [vmem:[#allocation10_spill] sm:$0xff] %v2924_v63  ;;  %v2997_v42 = vshll.u32 %v808_v44, 16  ;;  %v3023_v24 = vshll.u32 %v1003_v62, 16  ;;  %v1083_v5 = vperm.slane %v2924_v63, %v3011_v22  ;;  %v3037_v0 = vadd.s32 %v2950_v52, %v642_v3 }
 0x1b5   : > { %v884_v16 = vshll.u32 %v883_v47, 16  ;;  %v3040_v62 = vadd.s32 4294967256, %v3715_v34  ;;  %v3051_v52 = vadd.s32 4294967264, %v3715_v34 }
 0x1b6   : > { %v2932_v7 = vpop.xlane.xlu1 %730  ;;  %v1087_v47 = vperm.slane %v3037_v0, %v3016_v15 }
 0x1b7   : > { %v2928_v48 = vpop.xlane.xlu2 %670  ;;  %v2930_v11 = vpop.xlane.xlu0 %700  ;;  %3718 = vst [vmem:[#allocation11_spill] sm:$0xff] %v3040_v62 }
 0x1b8   : > { %v672_v36 = vcvt.f32.s32 %v2928_v48 }
 0x1be   : > { %v2938_v26 = vpop.xlane.xlu1 %775 }
 0x1bf   : > { %v2934_v6 = vpop.xlane.xlu2 %715  ;;  %v2936_v1 = vpop.xlane.xlu0 %745 }
 0x1c6   : > { %v2944_v4 = vpop.xlane.xlu1 %820 }
 0x1c7   : > { %v2940_v14 = vpop.xlane.xlu2 %760  ;;  %v2942_v61 = vpop.xlane.xlu0 %790 }
 0x1ce   : > { %v2959_v43 = vpop.xlane.xlu1 %865 }
 0x1cf   : > { %v2955_v46 = vpop.xlane.xlu2 %805  ;;  %v836_v27 = vpop.xlane.xlu0 %835 }
 0x1d0   : > { %v837_v28 = vcvt.f32.s32 %v836_v27  ;;  %v3002_v27 = vshll.u32 %v913_v35, 16  ;;  %v3028_v35 = vshll.u32 %v1018_v59, 16  ;;  %v3048_v59 = vadd.s32 4294967272, %v3715_v34 }
 0x1d2   : > { %v2971_v17 = vadd.s32 %v839_v37, %v837_v28  ;;  %v899_v37 = vshll.u32 %v898_v8, 16  ;;  %v3008_v28 = vshll.u32 %v958_v58, 16  ;;  %v867_v8 = vcvt.f32.s32 %v2959_v43  ;;  %3720 = vst [vmem:[#allocation14_spill] sm:$0xff] %v3048_v59 }
 0x1d3   : > { %v1081_v43 = vperm.slane %v2918_v9, %v3715_v34 }
 0x1d4   : > { %1731 = vst.msk [vmem:[#allocation2 - $0x7] sm:$0x80] %vm1730_vm1, %v2971_v17  ;;  %v3053_v3 = vadd.s32 %v869_v40, %v867_v8  ;;  %v3068_v40 = vadd.s32 %v2961_v30, %v687_v18  ;;  %v3071_v8 = vadd.s32 4294967232, %v3715_v34  ;;  %vm3649_vm1 = vcmask 1048512  }
 0x1d6   : > { %v3006_v21 = vpop.xlane.xlu1 %910  ;;  %v1143_v30 = vperm.slane %v3053_v3, %v3011_v22 }
 0x1d7   : > { %v851_v50 = vpop.xlane.xlu2 %850  ;;  %v881_v29 = vpop.xlane.xlu0 %880 }
 0x1d8   : > { %v852_v55 = vcvt.f32.s32 %v851_v50  ;;  %v882_v25 = vcvt.f32.s32 %v881_v29 }
 0x1da   : > { %v3042_v50 = vadd.s32 %v854_v56, %v852_v55  ;;  %v1085_v56 = vsel %vm1084_vm4, %v1083_v5, %v1081_v43  ;;  %v3057_v55 = vadd.s32 %v2973_v12, %v672_v36  ;;  %v3059_v31 = vadd.s32 %v884_v16, %v882_v25 }
 0x1db   : > { %v3074_v12 = vadd.s32 4294967248, %v3715_v34  ;;  %v912_v16 = vcvt.f32.s32 %v3006_v21  ;;  %v3632_v5 = vmov 0   ;;  %v1089_v36 = vsel %vm1088_vm5, %v1087_v47, %v1085_v56 }
 0x1dc   : > { %3719 = vst [vmem:[#allocation13_spill] sm:$0xff] %v3042_v50  ;;  %v1142_v9 = vperm.slane %v3042_v50, %v3715_v34  ;;  %1983 = vset.pattern.permute.xlu1 %v3632_v5  ;;  %v702_v25 = vcvt.f32.s32 %v2930_v11  ;;  %v1095_v21 = vperm.slane %v3057_v55, %v3051_v52  ;;  %v1145_v43 = vperm.slane %v3059_v31, %v3016_v15 }
 0x1dd   : > { %1180 = vperm.xlu1 %1983, %v2966_v10   ;;  %v3091_v11 = vadd.s32 4294967240, %v3715_v34  ;;  %v1099_v10 = vperm.slane %v3068_v40, %v3040_v62  ;;  %v732_v56 = vcvt.f32.s32 %v2932_v7  ;;  %v3101_v5 = vadd.s32 %v3002_v27, %v912_v16 }
 0x1de   : > { %v956_v44 = vpop.xlane.xlu1 %955  ;;  %v3104_v22 = vadd.s32 %v2975_v60, %v702_v25 }
 0x1df   : > { %v896_v48 = vpop.xlane.xlu2 %895  ;;  %v926_v29 = vpop.xlane.xlu0 %925  ;;  %v957_v7 = vcvt.f32.s32 %v956_v44  ;;  %v3129_v25 = vadd.s32 %v2963_v39, %v732_v56  ;;  %v1149_v44 = vperm.slane %v3101_v5, %v3051_v52 }
 0x1e0   : > { %v897_v58 = vcvt.f32.s32 %v896_v48  ;;  %v927_v18 = vcvt.f32.s32 %v926_v29  ;;  %v1103_v39 = vperm.slane %v3104_v22, %v3074_v12 }
 0x1e2   : > { %v3065_v63 = vadd.s32 %v899_v37, %v897_v58  ;;  %v717_v37 = vcvt.f32.s32 %v2934_v6  ;;  %v1091_v58 = vperm.slane %v2926_v33, %v3048_v59  ;;  %v1144_v6 = vsel %vm1084_vm4, %v1143_v30, %v1142_v9 }
 0x1e3   : > { %v3115_v27 = vadd.s32 %v3013_v38, %v927_v18  ;;  %v762_v38 = vcvt.f32.s32 %v2940_v14 }
 0x1e4   : > { %3721 = vst [vmem:[#allocation15_spill] sm:$0xff] %v3065_v63  ;;  %v1147_v47 = vperm.slane %v3065_v63, %v3048_v59  ;;  %v1093_v48 = vsel %vm3659_vm6, %v1091_v58, %v1089_v36  ;;  %v3107_v9 = vadd.s32 %v2980_v19, %v717_v37  ;;  %v3722_v59 = vlaneseq }
 0x1e5   : > { %v1097_v50 = vsel %vm3658_vm7, %v1095_v21, %v1093_v48  ;;  %v1146_v36 = vsel %vm1088_vm5, %v1145_v43, %v1144_v6  ;;  %v747_v21 = vcvt.f32.s32 %v2936_v1  ;;  %v3149_v6 = vadd.s32 4294967216, %v3715_v34 }
 0x1e6   : > { %v3110_v63 = vshrl.u32 %v3722_v59, 7  ;;  %v1148_v16 = vsel %vm3659_vm6, %v1147_v47, %v1146_v36  ;;  %v1001_v37 = vpop.xlane.xlu1 %1000  ;;  %v1107_v58 = vperm.slane %v3107_v9, %v3091_v11  ;;  %v3152_v1 = vadd.s32 %v3008_v28, %v957_v7 }
 0x1e7   : > { %v941_v29 = vpop.xlane.xlu2 %940  ;;  %v971_v15 = vpop.xlane.xlu0 %970  ;;  %v1150_v14 = vsel %vm3658_vm7, %v1149_v44, %v1148_v16  ;;  %v1151_v47 = vperm.slane %v3115_v27, %v3040_v62  ;;  %v3160_v56 = vadd.s32 %v2992_v13, %v762_v38  ;;  %v3164_v36 = vadd.s32 %v2982_v49, %v747_v21 }
 0x1e8   : > { %v942_v30 = vcvt.f32.s32 %v941_v29  ;;  %1984 = vset.pattern.permute.xlu2 %v3110_v63  ;;  %v3123_v19 = vadd.s32 8, %v3110_v63  ;;  %v3126_v59 = vadd.s32 24, %v3110_v63  ;;  %v972_v18 = vcvt.f32.s32 %v971_v15 }
 0x1e9   : > { %v1152_v28 = vsel %vm3657_vm8, %v1151_v47, %v1150_v14  ;;  %v777_v16 = vcvt.f32.s32 %v2938_v26  ;;  %v1002_v62 = vcvt.f32.s32 %v1001_v37  ;;  %v3173_v13 = vadd.s32 4294967208, %v3715_v34 }
 0x1ea   : > { %v3119_v60 = vadd.s32 %v3019_v2, %v942_v30  ;;  %v1101_v2 = vsel %vm3657_vm8, %v1099_v10, %v1097_v50  ;;  %1985 = vset.pattern.permute.xlu0 %v3123_v19  ;;  %1987 = vset.pattern.permute.xlu1 %v3126_v59  ;;  %v3146_v50 = vadd.s32 4294967224, %v3715_v34  ;;  %v1111_v10 = vperm.slane %v3129_v25, %v3071_v8 }
 0x1eb   : > { %v1105_v48 = vsel %vm3656_vm9, %v1103_v39, %v1101_v2  ;;  %v3170_v2 = vadd.s32 %v3021_v57, %v972_v18  ;;  %v1155_v38 = vperm.slane %v3152_v1, %v3091_v11  ;;  %v807_v26 = vcvt.f32.s32 %v2955_v46 }
 0x1ec   : > { %v1153_v43 = vperm.slane %v3119_v60, %v3074_v12  ;;  %v1109_v30 = vsel %vm3655_vm10, %v1107_v58, %v1105_v48  ;;  %v1119_v58 = vperm.slane %v3160_v56, %v3149_v6  ;;  %v1115_v57 = vperm.slane %v3164_v36, %v3146_v50 }
 0x1ed   : > { %v1113_v37 = vsel %vm3654_vm11, %v1111_v10, %v1109_v30  ;;  %v3194_v18 = vadd.s32 %v3023_v24, %v1002_v62  ;;  %v1157_v46 = vperm.slane %v3170_v2, %v3071_v8  ;;  %v3723_v10 = vcvt.f32.s32 %v2902_v23 }
 0x1ee   : > { %v1154_v44 = vsel %vm3656_vm9, %v1153_v43, %v1152_v28  ;;  %v792_v43 = vcvt.f32.s32 %v2942_v61  ;;  %v1046_v47 = vpop.xlane.xlu1 %1045  ;;  %v3210_v30 = vadd.s32 4294967192, %v3715_v34  ;;  %vm1488_vm8 = vcmp.lt.s32.totalorder %v2971_v17, 32 }
 0x1ef   : > { %v986_v15 = vpop.xlane.xlu2 %985  ;;  %v1016_v29 = vpop.xlane.xlu0 %1015  ;;  %v1156_v21 = vsel %vm3655_vm10, %v1155_v38, %v1154_v44  ;;  %v1034_v48 = vshll.u32 %v3723_v10, 16  ;;  %v1047_v28 = vcvt.f32.s32 %v1046_v47  ;;  %v822_v38 = vcvt.f32.s32 %v2944_v4 }
 0x1f0   : > { %v987_v7 = vcvt.f32.s32 %v986_v15  ;;  %v1017_v14 = vcvt.f32.s32 %v1016_v29  ;;  %v3201_v15 = vadd.s32 4294967200, %v3715_v34  ;;  %v1117_v29 = vsel %vm3653_vm12, %v1115_v57, %v1113_v37 }
 0x1f1   : > { %v1158_v61 = vsel %vm3654_vm11, %v1157_v46, %v1156_v21  ;;  %v1121_v62 = vsel %vm3652_vm13, %v1119_v58, %v1117_v29  ;;  %v1161_v58 = vperm.slane %v3194_v18, %v3149_v6  ;;  %v3724_v37 = vcvt.f32.s32 %v2888_v53 }
 0x1f2   : > { %v3178_v49 = vadd.s32 %v3026_v45, %v987_v7  ;;  %v3190_v45 = vadd.s32 %v2977_v51, %v777_v16  ;;  %v3205_v51 = vadd.s32 %v2997_v42, %v807_v26  ;;  %v3213_v23 = vadd.s32 %v3028_v35, %v1017_v14 }
 0x1f3   : > { %v3220_v26 = vadd.s32 %v2994_v41, %v792_v43  ;;  %v1049_v57 = vshll.u32 %v3724_v37, 16  ;;  %v3725_v35 = vcvt.f32.s32 %v2904_v54  ;;  %v1078_v14 = vcvt.f32.s32 %v2911_v32 }
 0x1f4   : > { %v1159_v39 = vperm.slane %v3178_v49, %v3146_v50  ;;  %v1123_v42 = vperm.slane %v3190_v45, %v3173_v13  ;;  %v1163_v43 = vperm.slane %v3213_v23, %v3173_v13  ;;  %v1131_v54 = vperm.slane %v3205_v51, %v3210_v30 }
 0x1f5   : > { %v1064_v21 = vshll.u32 %v3725_v35, 16  ;;  %v3233_v41 = vadd.s32 %v1049_v57, %v1047_v28  ;;  %v3242_v32 = vadd.s32 %v2987_v20, %v822_v38  ;;  %v1127_v10 = vperm.slane %v3220_v26, %v3201_v15 }
 0x1f6   : > { %v1160_v44 = vsel %vm3653_vm12, %v1159_v39, %v1158_v61  ;;  %v1125_v47 = vsel %vm3651_vm14, %v1123_v42, %v1121_v62  ;;  %v1079_v29 = vshll.u32 %v1078_v14, 16 }
 0x1f7   : > { %v1031_v24 = vpop.xlane.xlu2 %1030  ;;  %v1061_v16 = vpop.xlane.xlu0 %1060  ;;  %v1162_v4 = vsel %vm3652_vm13, %v1161_v58, %v1160_v44  ;;  %v1129_v28 = vsel %vm3646_vm15, %v1127_v10, %v1125_v47  ;;  %v1167_v42 = vperm.slane %v3233_v41, %v3210_v30 }
 0x1f8   : > { %v1032_v7 = vcvt.f32.s32 %v1031_v24  ;;  %v1062_v46 = vcvt.f32.s32 %v1061_v16  ;;  %v1164_v61 = vsel %vm3651_vm14, %v1163_v43, %v1162_v4  ;;  %v1133_v44 = vsel %vm3647_vm0, %v1131_v54, %v1129_v28 }
 0x1f9   : > { %v3280_v28 = vadd.s32 48, %v3110_v63  ;;  %vm1421_vm14 = vcmp.ne.s32.totalorder %v3220_v26, 0 }
 0x1fa   : > { %v3229_v39 = vadd.s32 %v1034_v48, %v1032_v7  ;;  %v3247_v48 = vadd.s32 4294967184, %v3715_v34  ;;  %v3250_v24 = vadd.s32 %v1064_v21, %v1062_v46  ;;  %v3254_v7 = vadd.s32 4294967176, %v3715_v34 }
 0x1fc   : > { %v1165_v53 = vperm.slane %v3229_v39, %v3201_v15  ;;  %v1135_v38 = vperm.slane %v3242_v32, %v3247_v48  ;;  %v1169_v35 = vperm.slane %v3250_v24, %v3247_v48  ;;  %v1139_v14 = vperm.slane %v2971_v17, %v3254_v7 }
 0x1fe   : > { %v1166_v20 = vsel %vm3646_vm15, %v1165_v53, %v1164_v61  ;;  %v1137_v57 = vsel %vm3650_vm2, %v1135_v38, %v1133_v44  ;;  %vm3648_vm15 = vcmask 1041409   ;;  %v3288_v44 = vadd.s32 88, %v3110_v63 }
 0x1ff   : > { %v1076_v62 = vpop.xlane.xlu2 %1075  ;;  %v1168_v37 = vsel %vm3647_vm0, %v1167_v42, %v1166_v20  ;;  %v1141_v4 = vsel %vm3649_vm1, %v1139_v14, %v1137_v57  ;;  %vm1177_vm0 = vcmp.eq.s32.totalorder %v3715_v34, 0  ;;  %v1198_v20 = vadd.s32 16, %v3110_v63 }
 0x200   : > { %v1077_v16 = vcvt.f32.s32 %v1076_v62  ;;  %v1170_v47 = vsel %vm3650_vm2, %v1169_v35, %v1168_v37  ;;  %v1216_v62 = vadd.s32 40, %v3110_v63  ;;  %v1210_v42 = vadd.s32 32, %v3110_v63 }
 0x201   : > { %v1246_v38 = vadd.s32 80, %v3110_v63  ;;  %v1228_v37 = vadd.s32 56, %v3110_v63  ;;  %v3300_v35 = vadd.s32 104, %v3110_v63  ;;  %v1276_v14 = vadd.s32 120, %v3110_v63 }
 0x202   : > { %v3262_v58 = vadd.s32 %v1079_v29, %v1077_v16  ;;  %v3285_v16 = vadd.s32 64, %v3110_v63 }
 0x204   : > { %v1729_v21 = vrot.slane %v3262_v58, 7  ;;  %v1171_v46 = vperm.slane %v3262_v58, %v3254_v7 }
 0x206   : > { %1733 = vst.msk [vmem:[#allocation2 + $0x1] sm:$0x1] %vm1732_vm3, %v1729_v21  ;;  %v1172_v43 = vsel %vm3649_vm1, %v1171_v46, %v1170_v47  ;;  %v1240_v21 = vadd.s32 72, %v3110_v63  ;;  %v1258_v46 = vadd.s32 96, %v3110_v63  ;;  %v1270_v47 = vadd.s32 112, %v3110_v63 }
 0x207   : > { %v1174_v53 = vsel %vm3648_vm15, %v1172_v43, %v1141_v4  ;;  %v3726_v4 = vmov 0   ;;  %vm1477_vm15 = vcmp.lt.s32.totalorder %v3057_v55, 32 }
 0x208   : > { %1175 = vrot.lane.b32.xlu0 %v1174_v53, %s2101_s3 }
 0x24f   : > { %v1181_v54 = vpop.permute.xlu1 %1180 }
 0x27a   : > { %v1176_v10 = vpop.permute.xlu0 %1175 }
 0x27b   : > { %v1182_v29 = vsel %vm1177_vm0, %v1181_v54, %v1176_v10  ;;  %vm1413_vm0 = vcmp.ne.s32.totalorder %v3057_v55, 0 }
 0x27c   : > { %v1183_v61 = vperm.slane %v1182_v29, 0  ;;  %v3296_v57 = vperm.slane %v1182_v29, 1 }
 0x27e   : > { %1206 = vperm.xlu1 %1987, %v1183_v61   ;;  %1194 = vperm.xlu0 %1985, %v1183_v61  }
 0x27f   : > { %1188 = vperm.xlu2 %1984, %v1183_v61  }
 0x286   : > { %1989 = vset.pattern.permute.xlu1 %v1216_v62  ;;  %1990 = vset.pattern.permute.xlu0 %v3280_v28 }
 0x287   : > { %1986 = vset.pattern.permute.xlu2 %v1198_v20 }
 0x28e   : > { %1218 = vperm.xlu1 %1989, %v1183_v61   ;;  %1224 = vperm.xlu0 %1990, %v1183_v61  }
 0x28f   : > { %1200 = vperm.xlu2 %1986, %v1183_v61  }
 0x296   : > { %1992 = vset.pattern.permute.xlu1 %v3285_v16  ;;  %1995 = vset.pattern.permute.xlu0 %v3288_v44 }
 0x297   : > { %1988 = vset.pattern.permute.xlu2 %v1210_v42 }
 0x29e   : > { %1236 = vperm.xlu1 %1992, %v1183_v61   ;;  %1254 = vperm.xlu0 %1995, %v1183_v61  }
 0x29f   : > { %1212 = vperm.xlu2 %1988, %v1183_v61  }
 0x2a6   : > { %1994 = vset.pattern.permute.xlu1 %v1246_v38  ;;  %2000 = vset.pattern.permute.xlu0 %v3110_v63 }
 0x2a7   : > { %1991 = vset.pattern.permute.xlu2 %v1228_v37 }
 0x2ae   : > { %1248 = vperm.xlu1 %1994, %v1183_v61   ;;  %1285 = vperm.xlu0 %2000, %v3296_v57  }
 0x2af   : > { %1230 = vperm.xlu2 %1991, %v1183_v61  }
 0x2b6   : > { %1997 = vset.pattern.permute.xlu1 %v3300_v35  ;;  %2005 = vset.pattern.permute.xlu0 %v1216_v62 }
 0x2b7   : > { %1993 = vset.pattern.permute.xlu2 %v1240_v21 }
 0x2be   : > { %1266 = vperm.xlu1 %1997, %v1183_v61   ;;  %1315 = vperm.xlu0 %2005, %v3296_v57  }
 0x2bf   : > { %1242 = vperm.xlu2 %1993, %v1183_v61  }
 0x2c6   : > { %1999 = vset.pattern.permute.xlu1 %v1276_v14  ;;  %2010 = vset.pattern.permute.xlu0 %v1246_v38  ;;  %v3728_v38 = vld [vmem:[#allocation8_spill] sm:$0xff] }
 0x2c7   : > { %1996 = vset.pattern.permute.xlu2 %v1258_v46 }
 0x2ce   : > { %1278 = vperm.xlu1 %1999, %v1183_v61   ;;  %1345 = vperm.xlu0 %2010, %v3296_v57  }
 0x2cf   : > { %1260 = vperm.xlu2 %1996, %v1183_v61  }
 0x2d6   : > { %2002 = vset.pattern.permute.xlu1 %v1198_v20  ;;  %2015 = vset.pattern.permute.xlu0 %v1276_v14 }
 0x2d7   : > { %1998 = vset.pattern.permute.xlu2 %v1270_v47 }
 0x2d9   : > { %v3313_v43 = vpop.permute.xlu2 %1188 }
 0x2de   : > { %1297 = vperm.xlu1 %2002, %v3296_v57   ;;  %1375 = vperm.xlu0 %2015, %v3296_v57  }
 0x2df   : > { %1272 = vperm.xlu2 %1998, %v1183_v61  }
 0x2e6   : > { %2004 = vset.pattern.permute.xlu1 %v1210_v42  ;;  %2018 = vset.pattern.permute.xlu0 %v3726_v4 }
 0x2e7   : > { %2001 = vset.pattern.permute.xlu2 %v3123_v19 }
 0x2e9   : > { %v3317_v63 = vpop.permute.xlu2 %1200 }
 0x2ee   : > { %1309 = vperm.xlu1 %2004, %v3296_v57  }
 0x2ef   : > { %1291 = vperm.xlu2 %2001, %v3296_v57  }
 0x2f0   : > { %v1207_v54 = vpop.permute.xlu1 %1206 }
 0x2f6   : > { %2007 = vset.pattern.permute.xlu1 %v1228_v37 }
 0x2f7   : > { %2003 = vset.pattern.permute.xlu2 %v3126_v59 }
 0x2f9   : > { %v1213_v53 = vpop.permute.xlu2 %1212 }
 0x2fa   : > { %vm1381_vm3 = vcmp.ne.s32.totalorder %v3057_v55, %v1213_v53 }
 0x2fb   : > { %vm1445_vm1 = vmand %vm1381_vm3, %vm1413_vm0 }
 0x2fc   : > { %vm1509_vm2 = vmand %vm1445_vm1, %vm1477_vm15  ;;  %vm1418_vm15 = vcmp.ne.s32.totalorder %v3164_v36, 0  ;;  %vm1482_vm1 = vcmp.lt.s32.totalorder %v3164_v36, 32 }
 0x2fd   : > { %v1541_v19 = vsel %vm1509_vm2, %v3057_v55, 4294967295 }
 0x2fe   : > { %1582 = vperm.xlu0 %2018, %v1541_v19   ;;  %1327 = vperm.xlu1 %2007, %v3296_v57  }
 0x2ff   : > { %1303 = vperm.xlu2 %2003, %v3296_v57  }
 0x300   : > { %v3338_v29 = vpop.permute.xlu1 %1218 }
 0x306   : > { %2009 = vset.pattern.permute.xlu1 %v1240_v21 }
 0x307   : > { %2006 = vset.pattern.permute.xlu2 %v3280_v28  ;;  %v1195_v28 = vpop.permute.xlu0 %1194 }
 0x309   : > { %v3329_v59 = vpop.permute.xlu2 %1230 }
 0x30e   : > { %1339 = vperm.xlu1 %2009, %v3296_v57  }
 0x30f   : > { %1321 = vperm.xlu2 %2006, %v3296_v57  }
 0x310   : > { %v1237_v61 = vpop.permute.xlu1 %1236 }
 0x316   : > { %2012 = vset.pattern.permute.xlu1 %v1258_v46 }
 0x317   : > { %2008 = vset.pattern.permute.xlu2 %v3285_v16 }
 0x319   : > { %v1243_v10 = vpop.permute.xlu2 %1242 }
 0x31a   : > { %vm1386_vm2 = vcmp.ne.s32.totalorder %v3164_v36, %v1243_v10  ;;  %v3733_v10 = vld [vmem:[#allocation13_spill] sm:$0xff] }
 0x31b   : > { %vm1450_vm0 = vmand %vm1386_vm2, %vm1418_vm15  ;;  %vm1485_vm2 = vcmp.lt.s32.totalorder %v3220_v26, 32 }
 0x31c   : > { %vm1514_vm3 = vmand %vm1450_vm0, %vm1482_vm1 }
 0x31d   : > { %v1546_v55 = vsel %vm1514_vm3, %v3164_v36, 4294967295  ;;  %v3727_v36 = vld [vmem:[#allocation10_spill] sm:$0xff] }
 0x31e   : > { %1597 = vperm.xlu0 %2018, %v1546_v55   ;;  %1357 = vperm.xlu1 %2012, %v3296_v57   ;;  %vm1378_vm3 = vcmp.ne.s32.totalorder %v3727_v36, %v1195_v28  ;;  %vm1410_vm13 = vcmp.ne.s32.totalorder %v3727_v36, 0  ;;  %vm1474_vm11 = vcmp.lt.s32.totalorder %v3727_v36, 32 }
 0x31f   : > { %1333 = vperm.xlu2 %2008, %v3296_v57   ;;  %vm1442_vm12 = vmand %vm1378_vm3, %vm1410_vm13  ;;  %vm1476_vm13 = vcmp.lt.s32.totalorder %v2926_v33, 32  ;;  %vm1409_vm3 = vcmp.ne.s32.totalorder %v3728_v38, 0 }
 0x320   : > { %v3349_v16 = vpop.permute.xlu1 %1248  ;;  %vm1506_vm10 = vmand %vm1442_vm12, %vm1474_vm11  ;;  %vm1377_vm12 = vcmp.ne.s32.totalorder %v3728_v38, %v3313_v43 }
 0x326   : > { %2014 = vset.pattern.permute.xlu1 %v1270_v47 }
 0x327   : > { %2011 = vset.pattern.permute.xlu2 %v3288_v44  ;;  %v1538_v44 = vsel %vm1506_vm10, %v3727_v36, 4294967295 }
 0x329   : > { %v1261_v62 = vpop.permute.xlu2 %1260 }
 0x32a   : > { %vm1389_vm15 = vcmp.ne.s32.totalorder %v3220_v26, %v1261_v62 }
 0x32b   : > { %vm1453_vm1 = vmand %vm1389_vm15, %vm1421_vm14  ;;  %vm1380_vm14 = vcmp.ne.s32.totalorder %v2926_v33, %v1207_v54  ;;  %vm1412_vm15 = vcmp.ne.s32.totalorder %v2926_v33, 0 }
 0x32c   : > { %vm1517_vm0 = vmand %vm1453_vm1, %vm1485_vm2 }
 0x32d   : > { %v1549_v20 = vsel %vm1517_vm0, %v3220_v26, 4294967295  ;;  %vm1444_vm2 = vmand %vm1380_vm14, %vm1412_vm15  ;;  %v1225_v26 = vpop.permute.xlu0 %1224  ;;  %vm1415_vm0 = vcmp.ne.s32.totalorder %v3104_v22, 0  ;;  %vm1479_vm15 = vcmp.lt.s32.totalorder %v3104_v22, 32 }
 0x32e   : > { %1606 = vperm.xlu0 %2018, %v1549_v20   ;;  %1369 = vperm.xlu1 %2014, %v3296_v57   ;;  %vm1508_vm1 = vmand %vm1444_vm2, %vm1476_vm13  ;;  %vm1383_vm11 = vcmp.ne.s32.totalorder %v3104_v22, %v1225_v26  ;;  %vm1424_vm13 = vcmp.ne.s32.totalorder %v2971_v17, 0 }
 0x32f   : > { %1351 = vperm.xlu2 %2011, %v3296_v57   ;;  %vm1447_vm10 = vmand %vm1383_vm11, %vm1415_vm0  ;;  %v1540_v37 = vsel %vm1508_vm1, %v2926_v33, 4294967295  ;;  %vm1473_vm1 = vcmp.lt.s32.totalorder %v3728_v38, 32 }
 0x330   : > { %v3357_v42 = vpop.permute.xlu1 %1266  ;;  %vm1441_vm14 = vmand %vm1377_vm12, %vm1409_vm3  ;;  %vm1385_vm12 = vcmp.ne.s32.totalorder %v3129_v25, %v1237_v61  ;;  %vm1379_vm3 = vcmp.ne.s32.totalorder %v3037_v0, %v3317_v63 }
 0x331   : > { %vm1511_vm2 = vmand %vm1447_vm10, %vm1479_vm15  ;;  %vm1417_vm10 = vcmp.ne.s32.totalorder %v3129_v25, 0  ;;  %vm1481_vm15 = vcmp.lt.s32.totalorder %v3129_v25, 32 }
 0x332   : > { %vm1505_vm7 = vmand %vm1441_vm14, %vm1473_vm1 }
 0x333   : > { %v1537_v14 = vsel %vm1505_vm7, %v3728_v38, 4294967295  ;;  %vm1420_vm7 = vcmp.ne.s32.totalorder %v3190_v45, 0 }
 0x336   : > { %2017 = vset.pattern.permute.xlu1 %v3726_v4 }
 0x337   : > { %2013 = vset.pattern.permute.xlu2 %v3300_v35  ;;  %1573 = vperm.xlu1 %2017, %v1538_v44   ;;  %v1255_v35 = vpop.permute.xlu0 %1254 }
 0x33f   : > { %1363 = vperm.xlu2 %2013, %v3296_v57   ;;  %1579 = vperm.xlu1 %2017, %v1540_v37   ;;  %v1543_v57 = vsel %vm1511_vm2, %v3104_v22, 4294967295  ;;  %v3381_v46 = vpop.permute.xlu0 %1285  ;;  %vm1388_vm2 = vcmp.ne.s32.totalorder %v3190_v45, %v1255_v35 }
 0x340   : > { %v1279_v21 = vpop.permute.xlu1 %1278  ;;  %vm1452_vm6 = vmand %vm1388_vm2, %vm1420_vm7  ;;  %vm1430_vm7 = vcmp.ne.s32.totalorder %v3115_v27, 0 }
 0x341   : > { %vm1392_vm9 = vcmp.ne.s32.totalorder %v2971_v17, %v1279_v21 }
 0x342   : > { %vm1456_vm11 = vmand %vm1392_vm9, %vm1424_vm13  ;;  %vm1475_vm13 = vcmp.lt.s32.totalorder %v3037_v0, 32 }
 0x343   : > { %vm1520_vm0 = vmand %vm1456_vm11, %vm1488_vm8  ;;  %vm1411_vm8 = vcmp.ne.s32.totalorder %v3037_v0, 0 }
 0x344   : > { %v1552_v33 = vsel %vm1520_vm0, %v2971_v17, 4294967295  ;;  %vm1449_vm9 = vmand %vm1385_vm12, %vm1417_vm10  ;;  %vm1382_vm0 = vcmp.ne.s32.totalorder %v3068_v40, %v3338_v29  ;;  %vm1414_vm12 = vcmp.ne.s32.totalorder %v3068_v40, 0  ;;  %vm1484_vm10 = vcmp.lt.s32.totalorder %v3190_v45, 32 }
 0x345   : > { %1615 = vperm.xlu0 %2018, %v1552_v33   ;;  %vm1443_vm14 = vmand %vm1379_vm3, %vm1411_vm8 }
 0x346   : > { %vm1513_vm11 = vmand %vm1449_vm9, %vm1481_vm15  ;;  %vm1427_vm9 = vcmp.ne.s32.totalorder %v3059_v31, 0  ;;  %vm1491_vm15 = vcmp.lt.s32.totalorder %v3059_v31, 32 }
 0x347   : > { %2016 = vset.pattern.permute.xlu2 %v3726_v4  ;;  %1588 = vperm.xlu1 %2017, %v1543_v57   ;;  %vm1507_vm1 = vmand %vm1443_vm14, %vm1475_vm13  ;;  %v1545_v17 = vsel %vm1513_vm11, %v3129_v25, 4294967295  ;;  %v1316_v47 = vpop.permute.xlu0 %1315  ;;  %v1273_v25 = vpop.permute.xlu2 %1272  ;;  %vm1478_vm11 = vcmp.lt.s32.totalorder %v3068_v40, 32  ;;  %v3735_v57 = vld [vmem:[#allocation12_spill] sm:$0xff] }
 0x348   : > { %1570 = vperm.xlu2 %2016, %v1537_v14   ;;  %v1539_v22 = vsel %vm1507_vm1, %v3037_v0, 4294967295  ;;  %vm1446_vm3 = vmand %vm1382_vm0, %vm1414_vm12  ;;  %vm1398_vm2 = vcmp.ne.s32.totalorder %v3115_v27, %v1316_v47  ;;  %vm1391_vm12 = vcmp.ne.s32.totalorder %v3242_v32, %v1273_v25 }
 0x349   : > { %vm3393_vm8 = vmand %vm1452_vm6, %vm1484_vm10  ;;  %vm1384_vm6 = vcmp.ne.s32.totalorder %v3107_v9, %v3329_v59  ;;  %vm1416_vm10 = vcmp.ne.s32.totalorder %v3107_v9, 0 }
 0x34a   : > { %vm3402_vm0 = vmand %vm1446_vm3, %vm1478_vm11  ;;  %v1548_v53 = vsel %vm3393_vm8, %v3190_v45, 4294967295 }
 0x34b   : > { %vm1448_vm3 = vmand %vm1384_vm6, %vm1416_vm10  ;;  %vm1419_vm10 = vcmp.ne.s32.totalorder %v3160_v56, 0 }
 0x34f   : > { %1594 = vperm.xlu1 %2017, %v1545_v17   ;;  %v1292_v19 = vpop.permute.xlu2 %1291  ;;  %v1346_v55 = vpop.permute.xlu0 %1345 }
 0x350   : > { %1576 = vperm.xlu2 %2016, %v1539_v22   ;;  %v1298_v4 = vpop.permute.xlu1 %1297  ;;  %vm1394_vm6 = vcmp.ne.s32.totalorder %v3053_v3, %v1292_v19 }
 0x351   : > { %vm1395_vm14 = vcmp.ne.s32.totalorder %v3059_v31, %v1298_v4 }
 0x352   : > { %vm1459_vm13 = vmand %vm1395_vm14, %vm1427_vm9  ;;  %vm1423_vm14 = vcmp.ne.s32.totalorder %v3242_v32, 0 }
 0x353   : > { %vm1523_vm1 = vmand %vm1459_vm13, %vm1491_vm15  ;;  %vm1494_vm15 = vcmp.lt.s32.totalorder %v3115_v27, 32 }
 0x354   : > { %v1555_v63 = vsel %vm1523_vm1, %v3059_v31, 4294967295  ;;  %vm1462_vm9 = vmand %vm1398_vm2, %vm1430_vm7  ;;  %v1542_v31 = vsel %vm3402_vm0, %v3068_v40, 4294967295  ;;  %vm1487_vm1 = vcmp.lt.s32.totalorder %v3242_v32, 32  ;;  %vm1480_vm2 = vcmp.lt.s32.totalorder %v3107_v9, 32 }
 0x355   : > { %1624 = vperm.xlu0 %2018, %v1555_v63   ;;  %vm1455_vm13 = vmand %vm1391_vm12, %vm1423_vm14  ;;  %vm1387_vm0 = vcmp.ne.s32.totalorder %v3160_v56, %v3349_v16  ;;  %vm1426_vm12 = vcmp.ne.s32.totalorder %v3053_v3, 0  ;;  %vm1490_vm14 = vcmp.lt.s32.totalorder %v3053_v3, 32 }
 0x356   : > { %vm1526_vm11 = vmand %vm1462_vm9, %vm1494_vm15  ;;  %vm1483_vm15 = vcmp.lt.s32.totalorder %v3160_v56, 32 }
 0x357   : > { %1603 = vperm.xlu1 %2017, %v1548_v53   ;;  %vm1519_vm7 = vmand %vm1455_vm13, %vm1487_vm1  ;;  %v1558_v45 = vsel %vm1526_vm11, %v3115_v27, 4294967295 }
 0x358   : > { %1585 = vperm.xlu2 %2016, %v1542_v31   ;;  %vm1512_vm8 = vmand %vm1448_vm3, %vm1480_vm2  ;;  %v1551_v40 = vsel %vm1519_vm7, %v3242_v32, 4294967295  ;;  %vm1390_vm2 = vcmp.ne.s32.totalorder %v3205_v51, %v3357_v42  ;;  %vm1429_vm7 = vcmp.ne.s32.totalorder %v3101_v5, 0  ;;  %v1376_v42 = vpop.permute.xlu0 %1375 }
 0x359   : > { %v1544_v59 = vsel %vm1512_vm8, %v3107_v9, 4294967295  ;;  %vm1458_vm9 = vmand %vm1394_vm6, %vm1426_vm12  ;;  %vm1422_vm8 = vcmp.ne.s32.totalorder %v3205_v51, 0  ;;  %v1304_v54 = vpop.permute.xlu2 %1303  ;;  %vm1493_vm12 = vcmp.lt.s32.totalorder %v3101_v5, 32 }
 0x35a   : > { %vm1451_vm3 = vmand %vm1387_vm0, %vm1419_vm10  ;;  %vm1486_vm10 = vcmp.lt.s32.totalorder %v3205_v51, 32 }
 0x35b   : > { %vm1522_vm13 = vmand %vm1458_vm9, %vm1490_vm14  ;;  %vm1393_vm14 = vcmp.ne.s32.totalorder %v3733_v10, %v3381_v46  ;;  %v3736_v46 = vld [vmem:[#allocation9_spill] sm:$0xff] }
 0x35c   : > { %vm1515_vm11 = vmand %vm1451_vm3, %vm1483_vm15  ;;  %v1554_v9 = vsel %vm1522_vm13, %v3053_v3, 4294967295  ;;  %vm1425_vm15 = vcmp.ne.s32.totalorder %v3733_v10, 0 }
 0x35d   : > { %1633 = vperm.xlu0 %2018, %v1558_v45   ;;  %v1547_v32 = vsel %vm1515_vm11, %v3160_v56, 4294967295  ;;  %vm1454_vm0 = vmand %vm1390_vm2, %vm1422_vm8  ;;  %vm1432_vm11 = vcmp.ne.s32.totalorder %v3152_v1, 0  ;;  %vm1496_vm2 = vcmp.lt.s32.totalorder %v3152_v1, 32  ;;  %vm1489_vm8 = vcmp.lt.s32.totalorder %v3733_v10, 32 }
 0x35e   : > { %vm1518_vm3 = vmand %vm1454_vm0, %vm1486_vm10 }
 0x35f   : > { %1612 = vperm.xlu1 %2017, %v1551_v40   ;;  %v1550_v56 = vsel %vm1518_vm3, %v3205_v51, 4294967295  ;;  %vm1457_vm13 = vmand %vm1393_vm14, %vm1425_vm15 }
 0x360   : > { %1591 = vperm.xlu2 %2016, %v1544_v59   ;;  %v1310_v27 = vpop.permute.xlu1 %1309 }
 0x361   : > { %vm1397_vm1 = vcmp.ne.s32.totalorder %v3101_v5, %v1310_v27 }
 0x362   : > { %vm1461_vm6 = vmand %vm1397_vm1, %vm1429_vm7 }
 0x363   : > { %vm1525_vm9 = vmand %vm1461_vm6, %vm1493_vm12  ;;  %vm1403_vm6 = vcmp.ne.s32.totalorder %v3194_v18, %v1346_v55  ;;  %v3737_v55 = vld [vmem:[#allocation14_spill] sm:$0xff] }
 0x364   : > { %v1557_v3 = vsel %vm1525_vm9, %v3101_v5, 4294967295  ;;  %vm1521_vm12 = vmand %vm1457_vm13, %vm1489_vm8  ;;  %v3734_v5 = vld [vmem:[#allocation15_spill] sm:$0xff]  ;;  %vm1435_vm9 = vcmp.ne.s32.totalorder %v3194_v18, 0 }
 0x365   : > { %vm1396_vm10 = vcmp.ne.s32.totalorder %v3734_v5, %v1304_v54  ;;  %vm1467_vm3 = vmand %vm1403_vm6, %vm1435_vm9  ;;  %vm1428_vm14 = vcmp.ne.s32.totalorder %v3734_v5, 0  ;;  %v1553_v62 = vsel %vm1521_vm12, %v3733_v10, 4294967295  ;;  %vm1497_vm6 = vcmp.lt.s32.totalorder %v3170_v2, 32 }
 0x366   : > { %vm1460_vm15 = vmand %vm1396_vm10, %vm1428_vm14  ;;  %vm1431_vm10 = vcmp.ne.s32.totalorder %v3119_v60, 0  ;;  %vm1495_vm14 = vcmp.lt.s32.totalorder %v3119_v60, 32 }
 0x367   : > { %1621 = vperm.xlu1 %2017, %v1554_v9  }
 0x368   : > { %1600 = vperm.xlu2 %2016, %v1547_v32  }
 0x369   : > { %v1322_v61 = vpop.permute.xlu2 %1321 }
 0x36a   : > { %vm1399_vm12 = vcmp.ne.s32.totalorder %v3119_v60, %v1322_v61 }
 0x36f   : > { %1630 = vperm.xlu1 %2017, %v1557_v3  }
 0x370   : > { %1609 = vperm.xlu2 %2016, %v1550_v56   ;;  %v1328_v29 = vpop.permute.xlu1 %1327 }
 0x371   : > { %vm1400_vm1 = vcmp.ne.s32.totalorder %v3152_v1, %v1328_v29 }
 0x372   : > { %vm1464_vm7 = vmand %vm1400_vm1, %vm1432_vm11  ;;  %vm1499_vm11 = vcmp.lt.s32.totalorder %v3194_v18, 32 }
 0x373   : > { %vm1528_vm0 = vmand %vm1464_vm7, %vm1496_vm2  ;;  %vm1492_vm2 = vcmp.lt.s32.totalorder %v3734_v5, 32  ;;  %vm1433_vm7 = vcmp.ne.s32.totalorder %v3170_v2, 0 }
 0x374   : > { %v1560_v51 = vsel %vm1528_vm0, %v3152_v1, 4294967295  ;;  %vm1531_vm1 = vmand %vm1467_vm3, %vm1499_vm11 }
 0x375   : > { %vm1524_vm13 = vmand %vm1460_vm15, %vm1492_vm2  ;;  %v1563_v36 = vsel %vm1531_vm1, %v3194_v18, 4294967295  ;;  %vm1434_vm2 = vcmp.ne.s32.totalorder %v3178_v49, 0  ;;  %vm1498_vm1 = vcmp.lt.s32.totalorder %v3178_v49, 32 }
 0x376   : > { %v1556_v20 = vsel %vm1524_vm13, %v3734_v5, 4294967295  ;;  %vm1463_vm3 = vmand %vm1399_vm12, %vm1431_vm10  ;;  %vm1437_vm10 = vcmp.ne.s32.totalorder %v3229_v39, 0 }
 0x377   : > { %1639 = vperm.xlu1 %2017, %v1560_v51   ;;  %vm1527_vm15 = vmand %vm1463_vm3, %vm1495_vm14 }
 0x378   : > { %1618 = vperm.xlu2 %2016, %v1553_v62  }
 0x379   : > { %v1334_v28 = vpop.permute.xlu2 %1333 }
 0x37a   : > { %vm1401_vm8 = vcmp.ne.s32.totalorder %v3170_v2, %v1334_v28 }
 0x37b   : > { %vm1465_vm9 = vmand %vm1401_vm8, %vm1433_vm7  ;;  %vm1436_vm8 = vcmp.ne.s32.totalorder %v3213_v23, 0 }
 0x37c   : > { %vm1529_vm0 = vmand %vm1465_vm9, %vm1497_vm6  ;;  %vm1500_vm9 = vcmp.lt.s32.totalorder %v3213_v23, 32 }
 0x37d   : > { %v1561_v1 = vsel %vm1529_vm0, %v3170_v2, 4294967295  ;;  %v1559_v2 = vsel %vm1527_vm15, %v3119_v60, 4294967295  ;;  %vm1501_vm15 = vcmp.lt.s32.totalorder %v3229_v39, 32 }
 0x37e   : > { %1642 = vperm.xlu0 %2018, %v1561_v1  }
 0x37f   : > { %1648 = vperm.xlu1 %2017, %v1563_v36  }
 0x380   : > { %1627 = vperm.xlu2 %2016, %v1556_v20   ;;  %v1340_v16 = vpop.permute.xlu1 %1339 }
 0x381   : > { %vm1402_vm11 = vcmp.ne.s32.totalorder %v3178_v49, %v1340_v16 }
 0x382   : > { %vm1466_vm7 = vmand %vm1402_vm11, %vm1434_vm2  ;;  %vm1408_vm11 = vcmp.ne.s32.totalorder %v3262_v58, %v1376_v42 }
 0x383   : > { %vm1530_vm13 = vmand %vm1466_vm7, %vm1498_vm1  ;;  %vm1440_vm7 = vcmp.ne.s32.totalorder %v3262_v58, 0 }
 0x384   : > { %v1562_v26 = vsel %vm1530_vm13, %v3178_v49, 4294967295  ;;  %vm1472_vm1 = vmand %vm1408_vm11, %vm1440_vm7  ;;  %vm1504_vm13 = vcmp.lt.s32.totalorder %v3262_v58, 32  ;;  %vm3738_vm7 = vcmask 261312  }
 0x388   : > { %1636 = vperm.xlu2 %2016, %v1559_v2  }
 0x389   : > { %v1352_v18 = vpop.permute.xlu2 %1351 }
 0x38a   : > { %vm1404_vm6 = vcmp.ne.s32.totalorder %v3213_v23, %v1352_v18 }
 0x38b   : > { %vm1468_vm0 = vmand %vm1404_vm6, %vm1436_vm8  ;;  %vm1438_vm6 = vcmp.ne.s32.totalorder %v3233_v41, 0 }
 0x38c   : > { %vm1532_vm12 = vmand %vm1468_vm0, %vm1500_vm9  ;;  %vm1502_vm0 = vcmp.lt.s32.totalorder %v3233_v41, 32 }
 0x38d   : > { %v1564_v44 = vsel %vm1532_vm12, %v3213_v23, 4294967295  ;;  %vm1536_vm8 = vmand %vm1472_vm1, %vm1504_vm13  ;;  %vm3739_vm1 = vcmask 326912   ;;  %vm3741_vm13 = vcmask 392512  }
 0x38e   : > { %1651 = vperm.xlu0 %2018, %v1564_v44   ;;  %v1568_v37 = vsel %vm1536_vm8, %v3262_v58, 4294967295  ;;  %vm3743_vm8 = vcmask 458112  }
 0x390   : > { %1645 = vperm.xlu2 %2016, %v1562_v26   ;;  %v1358_v60 = vpop.permute.xlu1 %1357 }
 0x391   : > { %vm1405_vm3 = vcmp.ne.s32.totalorder %v3229_v39, %v1358_v60 }
 0x392   : > { %vm1469_vm14 = vmand %vm1405_vm3, %vm1437_vm10  ;;  %vm1439_vm3 = vcmp.ne.s32.totalorder %v3250_v24, 0 }
 0x393   : > { %vm1533_vm2 = vmand %vm1469_vm14, %vm1501_vm15  ;;  %vm1503_vm15 = vcmp.lt.s32.totalorder %v3250_v24, 32 }
 0x394   : > { %v1565_v23 = vsel %vm1533_vm2, %v3229_v39, 4294967295 }
 0x398   : > { %1654 = vperm.xlu2 %2016, %v1565_v23  }
 0x399   : > { %v1364_v49 = vpop.permute.xlu2 %1363 }
 0x39a   : > { %vm1406_vm9 = vcmp.ne.s32.totalorder %v3233_v41, %v1364_v49 }
 0x39b   : > { %vm1470_vm12 = vmand %vm1406_vm9, %vm1438_vm6 }
 0x39c   : > { %vm1534_vm10 = vmand %vm1470_vm12, %vm1502_vm0  ;;  %vm3747_vm0 = vcmask 589312  }
 0x39d   : > { %v1566_v38 = vsel %vm1534_vm10, %v3233_v41, 4294967295  ;;  %vm3744_vm6 = vmmov %vm3739_vm1  ;;  %vm3749_vm10 = vcmask 654912  }
 0x39e   : > { %1657 = vperm.xlu1 %2017, %v1566_v38   ;;  %vm3746_vm9 = vmmov %vm3741_vm13 }
 0x39f   : > { %vm3748_vm12 = vmmov %vm3743_vm8 }
 0x3a0   : > { %1663 = vperm.xlu2 %2016, %v1568_v37   ;;  %v1370_v39 = vpop.permute.xlu1 %1369 }
 0x3a1   : > { %vm1407_vm14 = vcmp.ne.s32.totalorder %v3250_v24, %v1370_v39 }
 0x3a2   : > { %vm1471_vm11 = vmand %vm1407_vm14, %vm1439_vm3  ;;  %v1571_v35 = vpop.permute.xlu2 %1570 }
 0x3a3   : > { %vm1535_vm2 = vmand %vm1471_vm11, %vm1503_vm15  ;;  %v1665_v41 = vperm.slane %v1571_v35, %v3715_v34  ;;  %vm3752_vm15 = vcmask 720512   ;;  %vm3753_vm11 = vcmask 786112  }
 0x3a4   : > { %v1567_v21 = vsel %vm1535_vm2, %v3250_v24, 4294967295  ;;  %v1583_v24 = vpop.permute.xlu0 %1582  ;;  %vm3751_vm14 = vmmov %vm3747_vm0 }
 0x3a5   : > { %1660 = vperm.xlu0 %2018, %v1567_v21   ;;  %v1672_v1 = vperm.slane %v1583_v24, %v3051_v52  ;;  %vm3754_vm2 = vmmov %vm3749_vm10 }
 0x3a9   : > { %v1574_v33 = vpop.permute.xlu1 %1573 }
 0x3aa   : > { %v1666_v14 = vperm.slane %v1574_v33, %v3735_v57  ;;  %v1577_v58 = vpop.permute.xlu2 %1576 }
 0x3ab   : > { %v1668_v17 = vperm.slane %v1577_v58, %v3736_v46 }
 0x3ac   : > { %v1667_v22 = vsel %vm1084_vm4, %v1666_v14, %v1665_v41  ;;  %v1598_v45 = vpop.permute.xlu0 %1597 }
 0x3ad   : > { %v1669_v47 = vsel %vm1088_vm5, %v1668_v17, %v1667_v22  ;;  %v1682_v22 = vperm.slane %v1598_v45, %v3146_v50 }
 0x3b1   : > { %v1580_v4 = vpop.permute.xlu1 %1579 }
 0x3b2   : > { %v1586_v43 = vpop.permute.xlu2 %1585  ;;  %v1670_v29 = vperm.slane %v1580_v4, %v3737_v55 }
 0x3b4   : > { %v1607_v59 = vpop.permute.xlu0 %1606  ;;  %v1671_v62 = vsel %vm3738_vm7, %v1670_v29, %v1669_v47 }
 0x3b5   : > { %v1673_v16 = vsel %vm3739_vm1, %v1672_v1, %v1671_v62  ;;  %vm3756_vm1 = vmmov %vm3752_vm15 }
 0x3b9   : > { %v1589_v25 = vpop.permute.xlu1 %1588 }
 0x3ba   : > { %v1592_v0 = vpop.permute.xlu2 %1591  ;;  %v1676_v2 = vperm.slane %v1589_v25, %v3074_v12 }
 0x3bb   : > { %v1678_v49 = vperm.slane %v1592_v0, %v3091_v11 }
 0x3bc   : > { %v3501_v9 = vpop.permute.xlu0 %1615 }
 0x3c1   : > { %v1595_v63 = vpop.permute.xlu1 %1594 }
 0x3c2   : > { %v1601_v53 = vpop.permute.xlu2 %1600  ;;  %v1680_v39 = vperm.slane %v1595_v63, %v3071_v8 }
 0x3c7   : > { %v1625_v10 = vpop.permute.xlu0 %1624 }
 0x3c8   : > { %v1699_v36 = vperm.slane %v1625_v10, %v3736_v46 }
 0x3c9   : > { %v1604_v31 = vpop.permute.xlu1 %1603 }
 0x3ca   : > { %v3497_v19 = vpop.permute.xlu2 %1609  ;;  %v1686_v25 = vperm.slane %v1604_v31, %v3173_v13  ;;  %v1688_v31 = vperm.slane %v1607_v59, %v3201_v15 }
 0x3cf   : > { %v1634_v51 = vpop.permute.xlu0 %1633 }
 0x3d1   : > { %v3499_v40 = vpop.permute.xlu1 %1612 }
 0x3d2   : > { %v1619_v27 = vpop.permute.xlu2 %1618 }
 0x3d3   : > { %v1696_v5 = vperm.slane %v1619_v27, %v3715_v34  ;;  %v3740_v34 = vld [vmem:[#allocation11_spill] sm:$0xff] }
 0x3d4   : > { %v1674_v60 = vperm.slane %v1586_v43, %v3740_v34 }
 0x3d6   : > { %v1675_v23 = vsel %vm3741_vm13, %v1674_v60, %v1673_v16  ;;  %vm3757_vm13 = vmmov %vm3753_vm11 }
 0x3d7   : > { %v1677_v37 = vsel %vm3743_vm8, %v1676_v2, %v1675_v23  ;;  %vm3759_vm8 = vcmask 982912  }
 0x3d9   : > { %v1622_v32 = vpop.permute.xlu1 %1621 }
 0x3da   : > { %v1628_v54 = vpop.permute.xlu2 %1627  ;;  %v1697_v61 = vperm.slane %v1622_v32, %v3735_v57 }
 0x3db   : > { %v1701_v42 = vperm.slane %v1628_v54, %v3737_v55 }
 0x3dc   : > { %v1698_v28 = vsel %vm1084_vm4, %v1697_v61, %v1696_v5  ;;  %vm3742_vm4 = vmmov %vm3738_vm7  ;;  %vm3755_vm7 = vcmask 851712  }
 0x3dd   : > { %v1700_v18 = vsel %vm1088_vm5, %v1699_v36, %v1698_v28  ;;  %vm3745_vm5 = vcmask 523712  }
 0x3de   : > { %v1702_v38 = vsel %vm3742_vm4, %v1701_v42, %v1700_v18  ;;  %v1679_v33 = vsel %vm3745_vm5, %v1678_v49, %v1677_v37  ;;  %vm3750_vm3 = vmmov %vm3745_vm5  ;;  %vm3758_vm4 = vcmask 917312  }
 0x3df   : > { %v1681_v14 = vsel %vm3747_vm0, %v1680_v39, %v1679_v33  ;;  %vm3761_vm5 = vmmov %vm3758_vm4  ;;  %vm3763_vm0 = vcmask 1048512  }
 0x3e0   : > { %v1683_v43 = vsel %vm3749_vm10, %v1682_v22, %v1681_v14  ;;  %vm3765_vm10 = vcmask 1041409  }
 0x3e1   : > { %v1631_v3 = vpop.permute.xlu1 %1630 }
 0x3e2   : > { %v1637_v56 = vpop.permute.xlu2 %1636  ;;  %v1703_v44 = vperm.slane %v1631_v3, %v3051_v52  ;;  %v1705_v52 = vperm.slane %v1634_v51, %v3740_v34 }
 0x3e3   : > { %v1707_v58 = vperm.slane %v1637_v56, %v3074_v12 }
 0x3e4   : > { %v1704_v35 = vsel %vm3744_vm6, %v1703_v44, %v1702_v38  ;;  %vm3760_vm6 = vmmov %vm3755_vm7 }
 0x3e5   : > { %v1706_v41 = vsel %vm3746_vm9, %v1705_v52, %v1704_v35  ;;  %vm3762_vm9 = vmmov %vm3759_vm8 }
 0x3e6   : > { %v1708_v47 = vsel %vm3748_vm12, %v1707_v58, %v1706_v41  ;;  %vm3764_vm12 = vmmov %vm3763_vm0 }
 0x3e9   : > { %v1640_v20 = vpop.permute.xlu1 %1639 }
 0x3ea   : > { %v1646_v26 = vpop.permute.xlu2 %1645  ;;  %v1709_v57 = vperm.slane %v1640_v20, %v3091_v11  ;;  %v1684_v11 = vperm.slane %v1601_v53, %v3149_v6 }
 0x3ec   : > { %v1710_v0 = vsel %vm3750_vm3, %v1709_v57, %v1708_v47  ;;  %v1685_v24 = vsel %vm3752_vm15, %v1684_v11, %v1683_v43 }
 0x3ed   : > { %v1687_v27 = vsel %vm3753_vm11, %v1686_v25, %v1685_v24 }
 0x3ee   : > { %v1689_v53 = vsel %vm3755_vm7, %v1688_v31, %v1687_v27 }
 0x3f0   : > { %v1643_v21 = vpop.permute.xlu0 %1642 }
 0x3f1   : > { %v1711_v46 = vperm.slane %v1643_v21, %v3071_v8  ;;  %v1649_v17 = vpop.permute.xlu1 %1648  ;;  %v1713_v8 = vperm.slane %v1646_v26, %v3146_v50  ;;  %v1692_v50 = vperm.slane %v3499_v40, %v3247_v48 }
 0x3f2   : > { %v1655_v4 = vpop.permute.xlu2 %1654  ;;  %v1715_v45 = vperm.slane %v1649_v17, %v3149_v6  ;;  %v1690_v6 = vperm.slane %v3497_v19, %v3210_v30 }
 0x3f3   : > { %v1712_v63 = vsel %vm3751_vm14, %v1711_v46, %v1710_v0 }
 0x3f4   : > { %v1714_v32 = vsel %vm3754_vm2, %v1713_v8, %v1712_v63  ;;  %v1691_v29 = vsel %vm3758_vm4, %v1690_v6, %v1689_v53 }
 0x3f5   : > { %v1716_v3 = vsel %vm3756_vm1, %v1715_v45, %v1714_v32  ;;  %v1693_v61 = vsel %vm3759_vm8, %v1692_v50, %v1691_v29 }
 0x3fa   : > { %v1664_v59 = vpop.permute.xlu2 %1663 }
 0x400   : > { %v1652_v12 = vpop.permute.xlu0 %1651 }
 0x401   : > { %v1717_v54 = vperm.slane %v1652_v12, %v3173_v13  ;;  %v1719_v13 = vperm.slane %v1655_v4, %v3201_v15  ;;  %v1725_v15 = vperm.slane %v1664_v59, %v3254_v7 }
 0x403   : > { %v1718_v56 = vsel %vm3757_vm13, %v1717_v54, %v1716_v3 }
 0x404   : > { %v1720_v19 = vsel %vm3760_vm6, %v1719_v13, %v1718_v56 }
 0x410   : > { %v1658_v10 = vpop.permute.xlu1 %1657 }
 0x411   : > { %v1721_v55 = vperm.slane %v1658_v10, %v3210_v30  ;;  %v1694_v30 = vperm.slane %v3501_v9, %v3254_v7 }
 0x413   : > { %v1722_v51 = vsel %vm3761_vm5, %v1721_v55, %v1720_v19  ;;  %v1695_v28 = vsel %vm3763_vm0, %v1694_v30, %v1693_v61 }
 0x417   : > { %v1661_v40 = vpop.permute.xlu0 %1660 }
 0x418   : > { %v1723_v5 = vperm.slane %v1661_v40, %v3247_v48 }
 0x41a   : > { %v1724_v62 = vsel %vm3762_vm9, %v1723_v5, %v1722_v51 }
 0x41b   : > { %v1726_v1 = vsel %vm3764_vm12, %v1725_v15, %v1724_v62 }
 0x41c   : > { %v1727_v48 = vsel %vm3765_vm10, %v1726_v1, %v1695_v28 }
 0x41d   : > { %1728 = vst [vmem:[%s2199_s2] sm:$0x3] %v1727_v48 }
 0x41e   : > { %2046 = shalt.err (!%p2043_p8)
}
 0x41f   : > { %1925 = dma.vmem_to_hbm [thread:$0]  (%p2151_p5), %s1750_s9, 32, %s1752_s15, %s1735_s17  }
 0x420 PF: > { %p1931_p10 = scmp.ge.s32.totalorder %s2097_s11, 2  ;;  %s1763_s27 = sand.u32 1, %s2077_s6  }
 0x421   : > { %s1764_s28 = scalar_lea.sflag [#allocation5], %s1763_s27 }
 0x422   : > { %p1928_p11 = pnand %p1931_p10, %p2162_p9 }
 0x424   : > { %p1929_p12 = pneg %p1928_p11 }
 0x426   : > { %2072 = dma.done.wait (%p1929_p12), %s1764_s28, 32  }
 0x427   : > { %2074 = vsyncadd (%p1929_p12), %s1764_s28, 4294967264  ;;  %s14_s11 = sadd.s32 1, %s2097_s11   ;;  %s3766_s6 = smov %s2081_s7 }
 0x428   : > { %p11_p13 = scmp.ge.s32.totalorder %s14_s11, 5   ;;  %s3767_s7 = smov %s2085_s8 }
 0x429   : > { %s3768_s8 = smov %s2160_s18  ;;  %s3769_s9 = smov %s2093_s10 }
 0x42a   : > { %s3770_s10 = smov %s3772_s14  ;;  %13 = sbr.rel (!%p11_p13) target bundleno = 4 (0x4), region = 109 }
 0x42f   :  { %1770 = vsyncpa [#allocation5], 1 }
 0x430   :  { %1772 = vsyncpa [#allocation5 + $0x1], 1 }

</bundles_post_ra>
